<compile_context>
chip_gen: v7x
topology: tpu7x:2x2x1
jax: 0.10.0
libtpu: 0.0.40
codegen_flags: <defaults>
</compile_context>

<pallas_src>
import jax
import jax.numpy as jnp
from jax.experimental import pallas as pl
from jax.experimental.pallas import tpu as pltpu


# ----------------------------- configuration -------------------------------
GENERAL_DIM = 16                 # f_general dim == mlp_dims[0]
DOMAIN_DIM = 16                  # f_domain dim
SIDE_DIM = 16                    # f_side dim
DIM_HIDDEN = 32                  # gate hidden dim
MLP_DIMS = [GENERAL_DIM, 32, 8]  # tower dims
TASK_NUM = 2
GAMMA = 2.0
LAYER_NUM = len(MLP_DIMS) - 1

EP_GATE_IN = DOMAIN_DIM + GENERAL_DIM              # 32
PP_GATE_IN = SIDE_DIM + GENERAL_DIM                # 32
PP_HID_TOTAL = LAYER_NUM * DIM_HIDDEN              # 64  fused PP-gate hidden width
GATE_OUT_SIZES = [MLP_DIMS[l + 1] * TASK_NUM for l in range(LAYER_NUM)]
GATE_OUT_TOTAL = sum(GATE_OUT_SIZES)               # 80
TOWER0_OUT = TASK_NUM * MLP_DIMS[1]                # 64
FUSED_OEP_OUT = PP_HID_TOTAL + TOWER0_OUT          # 128 (lane-dense fused dot)
OUT_DIM = TASK_NUM * MLP_DIMS[-1]                  # 16
OUT_PAD = 128                                      # lane-dense output width

IN_DIM = DOMAIN_DIM + GENERAL_DIM + SIDE_DIM       # 48; packed [f_d, f_g, f_s]
FG_OFF = DOMAIN_DIM
FS_OFF = DOMAIN_DIM + GENERAL_DIM

BATCH = 2048                                       # rows per call for the example

# Bias segments: [EP b1, EP b2, PP-gate b1 (fused), PP-gate b2 (fused, permuted),
#                 tower b layer 0 (fused), tower b layer 1 (block-diag), ...]
_BIAS_SEG_SIZES = [DIM_HIDDEN, GENERAL_DIM, PP_HID_TOTAL, GATE_OUT_TOTAL] + \
                  [TASK_NUM * MLP_DIMS[l + 1] for l in range(LAYER_NUM)]


def _bias_layout():
    offs, off = [], 0
    for n in _BIAS_SEG_SIZES:
        offs.append(off)
        off += ((n + 127) // 128) * 128   # each segment starts 128-lane aligned
    return offs, off


BIAS_OFFSETS, BIAS_TOTAL = _bias_layout()


def _bf16_elementwise_ok():
    """bf16 element-wise gating only on chips with a bf16 VPU (v6e/v7x)."""
    try:
        kind = jax.devices()[0].device_kind.lower()
    except Exception:
        return False
    if any(s in kind for s in ("v2", "v3", "v4", "v5")):
        return False
    return ("v6" in kind) or ("v7" in kind)


EW_BF16 = _bf16_elementwise_ok()


def _choose_tile_b(batch):
    """128..512 rows/tile, multiple of 128, aiming for >=4 grid steps per core
    on a 2-TensorCore chip (harmless on 1-TC chips: still >=2 steps for DMA
    overlap once batch >= 256)."""
    tile = min(512, max(128, batch // 8))
    return max(128, (tile // 128) * 128)


# ------------------------------- kernel ------------------------------------
def _approx_sigmoid(x):
    # exp on the EUP; divide replaced by approximate reciprocal (also EUP slot).
    return pl.reciprocal(1.0 + jnp.exp(-x), approx=True)


def pepnet_kernel(fin_ref, ew1_ref, ew2_ref, gfs_ref, gfused_ref, gw2_ref, *rest):
    """One batch tile of the full PEPNet forward.

    rest = (tower_w_1, ..., tower_w_{L-1}, bias_packed, out)
    """
    tower_refs = rest[:LAYER_NUM - 1]
    b_ref = rest[LAYER_NUM - 1]
    out_ref = rest[LAYER_NUM]

    f32 = jnp.float32
    bf16 = jnp.bfloat16

    def bias(i):
        off = BIAS_OFFSETS[i]
        return b_ref[:, off:off + _BIAS_SEG_SIZES[i]]     # (1, n) f32, broadcasts

    fin = fin_ref[...]                                    # (TB, 48) f32
    fin16 = fin.astype(bf16)
    fg = fin[:, FG_OFF:FG_OFF + GENERAL_DIM]              # f32, for the gate multiply

    # --- EPNet: o_ep = gamma * sigmoid(MLP([f_domain, f_general])) * f_general
    eh = jnp.dot(fin16[:, 0:EP_GATE_IN], ew1_ref[...],
                 preferred_element_type=f32) + bias(0)
    eh = jnp.maximum(eh, 0.0)
    eg = jnp.dot(eh.astype(bf16), ew2_ref[...], preferred_element_type=f32) + bias(1)
    o_ep = (GAMMA * _approx_sigmoid(eg)) * fg             # (TB, 16) f32
    oep16 = o_ep.astype(bf16)

    # --- f_side contribution to the fused PP-gate hidden (off the o_ep chain)
    gh_fs = jnp.dot(fin16[:, FS_OFF:FS_OFF + SIDE_DIM], gfs_ref[...],
                    preferred_element_type=f32)           # (TB, 64)

    # --- single (16,128) dot: lanes [0:64]  = gate-hidden o_ep contribution
    #                          lanes [64:128] = tower layer-0 pre-activation
    fused = jnp.dot(oep16, gfused_ref[...], preferred_element_type=f32)

    gh = jnp.maximum(gh_fs + fused[:, 0:PP_HID_TOTAL] + bias(2), 0.0)
    gg = jnp.dot(gh.astype(bf16), gw2_ref[...], preferred_element_type=f32) + bias(3)
    gates = GAMMA * _approx_sigmoid(gg)                   # (TB, 80), task-major per layer

    # --- per-task towers, fused across tasks (gates sliced task-major) ---
    # TODO(synk): nn.Dropout(p=0.1) on hidden layers is eval-mode identity here.
    x16 = oep16
    x_out = None
    col = 0
    for l in range(LAYER_NUM):
        d = TASK_NUM * MLP_DIMS[l + 1]
        if l == 0:
            z = fused[:, PP_HID_TOTAL:PP_HID_TOTAL + d] + bias(4)
        else:
            z = jnp.dot(x16, tower_refs[l - 1][...],
                        preferred_element_type=f32) + bias(4 + l)
        g = gates[:, col:col + d]
        col += d
        if l == LAYER_NUM - 1:
            x_out = jax.nn.sigmoid(z) * g                 # exact sigmoid, f32 output
        elif EW_BF16:
            x16 = jnp.maximum(z, 0.0).astype(bf16) * g.astype(bf16)   # bf16 VPU path
        else:
            x16 = (jnp.maximum(z, 0.0) * g).astype(bf16)              # f32 VPU path (v5e)

    # Lane-dense (TB, 128) store: task outputs in lanes [0:OUT_DIM], zeros beyond.
    zpad = jnp.zeros((x_out.shape[0], OUT_PAD - OUT_DIM), dtype=f32)
    out_ref[...] = jnp.concatenate([x_out, zpad], axis=1).astype(out_ref.dtype)


# ------------------------------- wrapper ------------------------------------
@jax.jit
def pepnet_forward(f_domain, f_side, f_general, packed):
    """packed = (weights, bias_packed) from prepare_packed_params."""
    weights, bias_packed = packed
    b = f_domain.shape[0]
    tile_b = _choose_tile_b(b)

    # Single packed activation operand [f_domain, f_general, f_side] (one DMA/step).
    f_in = jnp.concatenate([f_domain, f_general, f_side], axis=1)
    pad = (-b) % tile_b
    if pad:
        f_in = jnp.pad(f_in, ((0, pad), (0, 0)))
    bp = b + pad

    def row_spec(d):
        return pl.BlockSpec((tile_b, d), lambda i: (i, 0))

    def const_spec(shape):
        # Constant index_map: fetched once, VMEM-resident across all grid steps.
        # (pl.Buffered(1) would also drop the unused double buffer; omitted for
        #  lowering portability across jax versions.)
        return pl.BlockSpec(shape, lambda i: (0, 0))

    in_specs = [row_spec(IN_DIM)]
    in_specs += [const_spec(w.shape) for w in weights]
    in_specs += [const_spec(bias_packed.shape)]

    flops_row = 2 * (EP_GATE_IN * DIM_HIDDEN + DIM_HIDDEN * GENERAL_DIM
                     + SIDE_DIM * PP_HID_TOTAL + GENERAL_DIM * FUSED_OEP_OUT
                     + PP_HID_TOTAL * GATE_OUT_TOTAL
                     + sum((TASK_NUM * MLP_DIMS[l]) * (TASK_NUM * MLP_DIMS[l + 1])
                           for l in range(1, LAYER_NUM)))
    weight_bytes = sum(w.size * w.dtype.itemsize for w in weights) \
        + bias_packed.size * bias_packed.dtype.itemsize
    cost = pl.CostEstimate(
        flops=flops_row * bp,
        transcendentals=bp * (GENERAL_DIM + GATE_OUT_TOTAL + OUT_DIM),
        bytes_accessed=bp * (IN_DIM + OUT_PAD) * 4 + weight_bytes)

    out = pl.pallas_call(
        pepnet_kernel,
        out_shape=jax.ShapeDtypeStruct((bp, OUT_PAD), jnp.float32),
        grid=(bp // tile_b,),
        in_specs=in_specs,
        out_specs=row_spec(OUT_PAD),
        compiler_params=pltpu.CompilerParams(
            dimension_semantics=("parallel",)),
        cost_estimate=cost,
    )(f_in, *weights, bias_packed)

    out = out[:b, :OUT_DIM]
    d = MLP_DIMS[-1]
    return [out[:, t * d:(t + 1) * d] for t in range(TASK_NUM)]


# -------------------- one-time parameter packing (hoisted) -------------------
def prepare_packed_params(params, weight_dtype=jnp.bfloat16):
    """Fuse / permute / pack parameters once (not per forward call)."""
    ew1, eb1, ew2, eb2 = params["ep_gate"]

    # PPNet gate layer-1: columns concatenated across layers; split by input row
    # into the f_side part and the o_ep part.
    gw1 = jnp.concatenate([params["pp_gate"][l][0] for l in range(LAYER_NUM)], axis=1)
    gb1 = jnp.concatenate([params["pp_gate"][l][1] for l in range(LAYER_NUM)])
    gw1_fs = gw1[:SIDE_DIM]                   # (16, 64)  f_side contribution
    gw1_oep = gw1[SIDE_DIM:PP_GATE_IN]        # (16, 64)  o_ep contribution

    # PPNet gate layer-2: block-diagonal with task-major column permutation
    # (original column j*T + t  ->  fused column t*d + j), reproducing
    # reshape(B, -1, T)[:, :, t] as a contiguous task-major slab.
    gw2 = jnp.zeros((PP_HID_TOTAL, GATE_OUT_TOTAL), jnp.float32)
    gb2_list = []
    col = 0
    for l in range(LAYER_NUM):
        d = MLP_DIMS[l + 1]
        perm = jnp.asarray([j * TASK_NUM + t for t in range(TASK_NUM) for j in range(d)],
                           dtype=jnp.int32)
        gw2 = gw2.at[l * DIM_HIDDEN:(l + 1) * DIM_HIDDEN,
                     col:col + TASK_NUM * d].set(params["pp_gate"][l][2][:, perm])
        gb2_list.append(params["pp_gate"][l][3][perm])
        col += TASK_NUM * d
    gb2 = jnp.concatenate(gb2_list)

    # Towers: layer 0 shares input o_ep -> concat across tasks, then fuse with
    # the o_ep part of the gate layer-1 into one lane-dense (16, 128) weight.
    tw0 = jnp.concatenate([params["tower"][t][0][0] for t in range(TASK_NUM)], axis=1)
    tb0 = jnp.concatenate([params["tower"][t][0][1] for t in range(TASK_NUM)])
    w_oep_fused = jnp.concatenate([gw1_oep, tw0], axis=1)     # (16, 128)

    tower_ws, tower_bs = [], [tb0]
    for l in range(1, LAYER_NUM):
        din, dout = MLP_DIMS[l], MLP_DIMS[l + 1]
        w = jnp.zeros((TASK_NUM * din, TASK_NUM * dout), jnp.float32)
        bs = []
        for t in range(TASK_NUM):
            w = w.at[t * din:(t + 1) * din, t * dout:(t + 1) * dout].set(
                params["tower"][t][l][0])
            bs.append(params["tower"][t][l][1])
        tower_ws.append(w)
        tower_bs.append(jnp.concatenate(bs))

    # Single packed bias operand; each segment starts at a 128-lane boundary.
    bias_segs = [eb1, eb2, gb1, gb2] + tower_bs
    packed = jnp.zeros((BIAS_TOTAL,), jnp.float32)
    for seg, off in zip(bias_segs, BIAS_OFFSETS):
        packed = packed.at[off:off + seg.shape[0]].set(seg)
    bias_packed = packed.reshape(1, BIAS_TOTAL)

    weights = [ew1, ew2, gw1_fs, w_oep_fused, gw2] + tower_ws
    weights = [jnp.asarray(w, weight_dtype) for w in weights]
    return weights, bias_packed


# --------------------------- pure-JAX references -----------------------------
def pepnet_reference(f_domain, f_side, f_general, params, matmul_dtype=jnp.float32):
    """Unfused reference, faithful to the PyTorch forward (eval mode).

    matmul_dtype=bf16 mirrors the kernel's MXU precision (f32 accumulation)."""
    def mm(x, w):
        return jnp.dot(x.astype(matmul_dtype), w.astype(matmul_dtype),
                       preferred_element_type=jnp.float32)

    ew1, eb1, ew2, eb2 = params["ep_gate"]
    fe = jnp.concatenate([f_domain, f_general], axis=-1)
    eg = GAMMA * jax.nn.sigmoid(mm(jax.nn.relu(mm(fe, ew1) + eb1), ew2) + eb2)
    o_ep = eg * f_general

    f = jnp.concatenate([f_side, o_ep], axis=1)
    feat_list = []
    for l in range(LAYER_NUM):
        gw1, gb1, gw2, gb2 = params["pp_gate"][l]
        w = GAMMA * jax.nn.sigmoid(mm(jax.nn.relu(mm(f, gw1) + gb1), gw2) + gb2)
        feat_list.append(w.reshape(f.shape[0], -1, TASK_NUM))

    outs = []
    for t in range(TASK_NUM):
        x = o_ep
        for l in range(LAYER_NUM):
            tw, tb = params["tower"][t][l]
            z = mm(x, tw) + tb
            a = jax.nn.sigmoid(z) if l == LAYER_NUM - 1 else jax.nn.relu(z)
            x = a * feat_list[l][:, :, t]
        outs.append(x)
    return outs


# --------------------------------- init --------------------------------------
def init_params(key):
    params = {"ep_gate": None, "pp_gate": [], "tower": []}
    n_keys = 4 + 4 * LAYER_NUM + 2 * TASK_NUM * LAYER_NUM
    keys = iter(jax.random.split(key, n_keys))

    def nxt():
        return next(keys)

    ew1 = jax.random.normal(nxt(), (EP_GATE_IN, DIM_HIDDEN), jnp.float32) / jnp.sqrt(EP_GATE_IN)
    eb1 = jax.random.normal(nxt(), (DIM_HIDDEN,), jnp.float32) * 0.01
    ew2 = jax.random.normal(nxt(), (DIM_HIDDEN, GENERAL_DIM), jnp.float32) / jnp.sqrt(DIM_HIDDEN)
    eb2 = jax.random.normal(nxt(), (GENERAL_DIM,), jnp.float32) * 0.01
    params["ep_gate"] = (ew1, eb1, ew2, eb2)

    for l in range(LAYER_NUM):
        dout = MLP_DIMS[l + 1] * TASK_NUM
        gw1 = jax.random.normal(nxt(), (PP_GATE_IN, DIM_HIDDEN), jnp.float32) / jnp.sqrt(PP_GATE_IN)
        gb1 = jax.random.normal(nxt(), (DIM_HIDDEN,), jnp.float32) * 0.01
        gw2 = jax.random.normal(nxt(), (DIM_HIDDEN, dout), jnp.float32) / jnp.sqrt(DIM_HIDDEN)
        gb2 = jax.random.normal(nxt(), (dout,), jnp.float32) * 0.01
        params["pp_gate"].append((gw1, gb1, gw2, gb2))

    for t in range(TASK_NUM):
        per_task = []
        for l in range(LAYER_NUM):
            din, dout = MLP_DIMS[l], MLP_DIMS[l + 1]
            tw = jax.random.normal(nxt(), (din, dout), jnp.float32) / jnp.sqrt(din)
            tb = jax.random.normal(nxt(), (dout,), jnp.float32) * 0.01
            per_task.append((tw, tb))
        params["tower"].append(per_task)
    return params


# --------------------------------- main --------------------------------------
if __name__ == "__main__":
    key = jax.random.PRNGKey(0)
    kp, kd, ks, kg = jax.random.split(key, 4)

    params = init_params(kp)
    packed = prepare_packed_params(params)    # one-time packing / permutation

    f_domain = jax.random.normal(kd, (BATCH, DOMAIN_DIM), jnp.float32)
    f_side = jax.random.normal(ks, (BATCH, SIDE_DIM), jnp.float32)
    f_general = jax.random.normal(kg, (BATCH, GENERAL_DIM), jnp.float32)

    outs = pepnet_forward(f_domain, f_side, f_general, packed)
    outs = jax.block_until_ready(outs)

    # Precision-matched reference (bf16 MXU inputs, f32 accumulate).  The kernel
    # additionally uses an approximate reciprocal for the gate sigmoids (and
    # bf16 element-wise gating on v6e/v7x), so the accepted accuracy contract
    # vs this reference is 3e-2.
    refs_bf16 = pepnet_reference(f_domain, f_side, f_general, params,
                                 matmul_dtype=jnp.bfloat16)
    # Full-f32 reference: loose sanity check (documents expected bf16 deviation).
    refs_f32 = pepnet_reference(f_domain, f_side, f_general, params,
                                matmul_dtype=jnp.float32)

    for t in range(TASK_NUM):
        assert outs[t].shape == (BATCH, MLP_DIMS[-1])
        err_m = float(jnp.max(jnp.abs(outs[t] - refs_bf16[t])))
        err_f = float(jnp.max(jnp.abs(outs[t] - refs_f32[t])))
        assert jnp.allclose(outs[t], refs_bf16[t], atol=3e-2, rtol=3e-2), \
            f"task {t}: mismatch vs bf16-matched reference (max abs err {err_m})"
        assert jnp.allclose(outs[t], refs_f32[t], atol=1.5e-1, rtol=0.0), \
            f"task {t}: mismatch vs f32 reference (max abs err {err_f})"

    print("KERNEL_OK")
</pallas_src>

<mosaic_0001>
module attributes {stable_mosaic.version = 11 : i64} {
  func.func @pepnet_kernel(%arg0: i32, %arg1: memref<256x48xf32, #tpu.memory_space<vmem>>, %arg2: memref<32x32xbf16, #tpu.memory_space<vmem>>, %arg3: memref<32x16xbf16, #tpu.memory_space<vmem>>, %arg4: memref<16x64xbf16, #tpu.memory_space<vmem>>, %arg5: memref<16x128xbf16, #tpu.memory_space<vmem>>, %arg6: memref<64x80xbf16, #tpu.memory_space<vmem>>, %arg7: memref<64x16xbf16, #tpu.memory_space<vmem>>, %arg8: memref<1x768xf32, #tpu.memory_space<vmem>>, %arg9: memref<256x128xf32, #tpu.memory_space<vmem>>) attributes {dimension_semantics = [#tpu.dimension_semantics<parallel>], iteration_bounds = array<i64: 8>, scalar_prefetch = 0 : i64, scratch_operands = 0 : i64, tpu.core_type = #tpu.core_type<tc>, window_params = [{transform_indices = @transform_0, window_bounds = array<i64: 256, 48>}, {pipeline_mode = #tpu.pipeline_mode<synchronous>, transform_indices = @transform_1, window_bounds = array<i64: 32, 32>}, {pipeline_mode = #tpu.pipeline_mode<synchronous>, transform_indices = @transform_2, window_bounds = array<i64: 32, 16>}, {pipeline_mode = #tpu.pipeline_mode<synchronous>, transform_indices = @transform_3, window_bounds = array<i64: 16, 64>}, {pipeline_mode = #tpu.pipeline_mode<synchronous>, transform_indices = @transform_4, window_bounds = array<i64: 16, 128>}, {pipeline_mode = #tpu.pipeline_mode<synchronous>, transform_indices = @transform_5, window_bounds = array<i64: 64, 80>}, {pipeline_mode = #tpu.pipeline_mode<synchronous>, transform_indices = @transform_6, window_bounds = array<i64: 64, 16>}, {pipeline_mode = #tpu.pipeline_mode<synchronous>, transform_indices = @transform_7, window_bounds = array<i64: 1, 768>}, {transform_indices = @transform_8, window_bounds = array<i64: 256, 128>}]} {
    %c0 = arith.constant 0 : index
    %c0_0 = arith.constant 0 : index
    %0 = vector.load %arg1[%c0, %c0_0] : memref<256x48xf32, #tpu.memory_space<vmem>>, vector<256x48xf32>
    %1 = arith.truncf %0 : vector<256x48xf32> to vector<256x48xbf16>
    %2 = vector.extract_strided_slice %0 {offsets = [0, 16], sizes = [256, 16], strides = [1, 1]} : vector<256x48xf32> to vector<256x16xf32>
    %3 = vector.extract_strided_slice %1 {offsets = [0, 0], sizes = [256, 32], strides = [1, 1]} : vector<256x48xbf16> to vector<256x32xbf16>
    %c0_1 = arith.constant 0 : index
    %c0_2 = arith.constant 0 : index
    %4 = vector.load %arg2[%c0_1, %c0_2] : memref<32x32xbf16, #tpu.memory_space<vmem>>, vector<32x32xbf16>
    %cst = arith.constant dense<0.000000e+00> : vector<256x32xf32>
    %5 = tpu.matmul %3, %4, %cst {dimension_numbers = #tpu.dot_dimension_numbers<[1], [0], [0], [1], [0, 0, 1, 1], [], []>} : vector<256x32xbf16>, vector<32x32xbf16>, vector<256x32xf32> -> vector<256x32xf32>
    %c0_3 = arith.constant 0 : index
    %c0_4 = arith.constant 0 : index
    %6 = vector.load %arg8[%c0_3, %c0_4] : memref<1x768xf32, #tpu.memory_space<vmem>>, vector<1x32xf32>
    %7 = vector.broadcast %6 : vector<1x32xf32> to vector<256x32xf32>
    %8 = arith.addf %5, %7 : vector<256x32xf32>
    %cst_5 = arith.constant 0.000000e+00 : f32
    %9 = vector.broadcast %cst_5 : f32 to vector<256x32xf32>
    %10 = arith.maximumf %8, %9 : vector<256x32xf32>
    %11 = arith.truncf %10 : vector<256x32xf32> to vector<256x32xbf16>
    %c0_6 = arith.constant 0 : index
    %c0_7 = arith.constant 0 : index
    %12 = vector.load %arg3[%c0_6, %c0_7] : memref<32x16xbf16, #tpu.memory_space<vmem>>, vector<32x16xbf16>
    %cst_8 = arith.constant dense<0.000000e+00> : vector<256x16xf32>
    %13 = tpu.matmul %11, %12, %cst_8 {dimension_numbers = #tpu.dot_dimension_numbers<[1], [0], [0], [1], [0, 0, 1, 1], [], []>} : vector<256x32xbf16>, vector<32x16xbf16>, vector<256x16xf32> -> vector<256x16xf32>
    %c0_9 = arith.constant 0 : index
    %c128 = arith.constant 128 : index
    %14 = vector.load %arg8[%c0_9, %c128] : memref<1x768xf32, #tpu.memory_space<vmem>>, vector<1x16xf32>
    %15 = vector.broadcast %14 : vector<1x16xf32> to vector<256x16xf32>
    %16 = arith.addf %13, %15 : vector<256x16xf32>
    %cst_10 = arith.constant 0.000000e+00 : f32
    %17 = vector.broadcast %cst_10 : f32 to vector<256x16xf32>
    %18 = arith.subf %17, %16 : vector<256x16xf32>
    %19 = math.exp %18 : vector<256x16xf32>
    %cst_11 = arith.constant 1.000000e+00 : f32
    %20 = vector.broadcast %cst_11 : f32 to vector<256x16xf32>
    %21 = arith.addf %20, %19 : vector<256x16xf32>
    %22 = tpu.reciprocal %21 {approx = true} : vector<256x16xf32> -> vector<256x16xf32>
    %cst_12 = arith.constant 2.000000e+00 : f32
    %23 = vector.broadcast %cst_12 : f32 to vector<256x16xf32>
    %24 = arith.mulf %23, %22 : vector<256x16xf32>
    %25 = arith.mulf %24, %2 : vector<256x16xf32>
    %26 = arith.truncf %25 : vector<256x16xf32> to vector<256x16xbf16>
    %27 = vector.extract_strided_slice %1 {offsets = [0, 32], sizes = [256, 16], strides = [1, 1]} : vector<256x48xbf16> to vector<256x16xbf16>
    %c0_13 = arith.constant 0 : index
    %c0_14 = arith.constant 0 : index
    %28 = vector.load %arg4[%c0_13, %c0_14] : memref<16x64xbf16, #tpu.memory_space<vmem>>, vector<16x64xbf16>
    %cst_15 = arith.constant dense<0.000000e+00> : vector<256x64xf32>
    %29 = tpu.matmul %27, %28, %cst_15 {dimension_numbers = #tpu.dot_dimension_numbers<[1], [0], [0], [1], [0, 0, 1, 1], [], []>} : vector<256x16xbf16>, vector<16x64xbf16>, vector<256x64xf32> -> vector<256x64xf32>
    %c0_16 = arith.constant 0 : index
    %c0_17 = arith.constant 0 : index
    %30 = vector.load %arg5[%c0_16, %c0_17] : memref<16x128xbf16, #tpu.memory_space<vmem>>, vector<16x128xbf16>
    %cst_18 = arith.constant dense<0.000000e+00> : vector<256x128xf32>
    %31 = tpu.matmul %26, %30, %cst_18 {dimension_numbers = #tpu.dot_dimension_numbers<[1], [0], [0], [1], [0, 0, 1, 1], [], []>} : vector<256x16xbf16>, vector<16x128xbf16>, vector<256x128xf32> -> vector<256x128xf32>
    %32 = vector.extract_strided_slice %31 {offsets = [0, 0], sizes = [256, 64], strides = [1, 1]} : vector<256x128xf32> to vector<256x64xf32>
    %33 = arith.addf %29, %32 : vector<256x64xf32>
    %c0_19 = arith.constant 0 : index
    %c256 = arith.constant 256 : index
    %34 = vector.load %arg8[%c0_19, %c256] : memref<1x768xf32, #tpu.memory_space<vmem>>, vector<1x64xf32>
    %35 = vector.broadcast %34 : vector<1x64xf32> to vector<256x64xf32>
    %36 = arith.addf %33, %35 : vector<256x64xf32>
    %cst_20 = arith.constant 0.000000e+00 : f32
    %37 = vector.broadcast %cst_20 : f32 to vector<256x64xf32>
    %38 = arith.maximumf %36, %37 : vector<256x64xf32>
    %39 = arith.truncf %38 : vector<256x64xf32> to vector<256x64xbf16>
    %c0_21 = arith.constant 0 : index
    %c0_22 = arith.constant 0 : index
    %40 = vector.load %arg6[%c0_21, %c0_22] : memref<64x80xbf16, #tpu.memory_space<vmem>>, vector<64x80xbf16>
    %cst_23 = arith.constant dense<0.000000e+00> : vector<256x80xf32>
    %41 = tpu.matmul %39, %40, %cst_23 {dimension_numbers = #tpu.dot_dimension_numbers<[1], [0], [0], [1], [0, 0, 1, 1], [], []>} : vector<256x64xbf16>, vector<64x80xbf16>, vector<256x80xf32> -> vector<256x80xf32>
    %c0_24 = arith.constant 0 : index
    %c384 = arith.constant 384 : index
    %42 = vector.load %arg8[%c0_24, %c384] : memref<1x768xf32, #tpu.memory_space<vmem>>, vector<1x80xf32>
    %43 = vector.broadcast %42 : vector<1x80xf32> to vector<256x80xf32>
    %44 = arith.addf %41, %43 : vector<256x80xf32>
    %cst_25 = arith.constant 0.000000e+00 : f32
    %45 = vector.broadcast %cst_25 : f32 to vector<256x80xf32>
    %46 = arith.subf %45, %44 : vector<256x80xf32>
    %47 = math.exp %46 : vector<256x80xf32>
    %cst_26 = arith.constant 1.000000e+00 : f32
    %48 = vector.broadcast %cst_26 : f32 to vector<256x80xf32>
    %49 = arith.addf %48, %47 : vector<256x80xf32>
    %50 = tpu.reciprocal %49 {approx = true} : vector<256x80xf32> -> vector<256x80xf32>
    %cst_27 = arith.constant 2.000000e+00 : f32
    %51 = vector.broadcast %cst_27 : f32 to vector<256x80xf32>
    %52 = arith.mulf %51, %50 : vector<256x80xf32>
    %53 = vector.extract_strided_slice %31 {offsets = [0, 64], sizes = [256, 64], strides = [1, 1]} : vector<256x128xf32> to vector<256x64xf32>
    %c0_28 = arith.constant 0 : index
    %c512 = arith.constant 512 : index
    %54 = vector.load %arg8[%c0_28, %c512] : memref<1x768xf32, #tpu.memory_space<vmem>>, vector<1x64xf32>
    %55 = vector.broadcast %54 : vector<1x64xf32> to vector<256x64xf32>
    %56 = arith.addf %53, %55 : vector<256x64xf32>
    %57 = vector.extract_strided_slice %52 {offsets = [0, 0], sizes = [256, 64], strides = [1, 1]} : vector<256x80xf32> to vector<256x64xf32>
    %cst_29 = arith.constant 0.000000e+00 : f32
    %58 = vector.broadcast %cst_29 : f32 to vector<256x64xf32>
    %59 = arith.maximumf %56, %58 : vector<256x64xf32>
    %60 = arith.mulf %59, %57 : vector<256x64xf32>
    %61 = arith.truncf %60 : vector<256x64xf32> to vector<256x64xbf16>
    %c0_30 = arith.constant 0 : index
    %c0_31 = arith.constant 0 : index
    %62 = vector.load %arg7[%c0_30, %c0_31] : memref<64x16xbf16, #tpu.memory_space<vmem>>, vector<64x16xbf16>
    %cst_32 = arith.constant dense<0.000000e+00> : vector<256x16xf32>
    %63 = tpu.matmul %61, %62, %cst_32 {dimension_numbers = #tpu.dot_dimension_numbers<[1], [0], [0], [1], [0, 0, 1, 1], [], []>} : vector<256x64xbf16>, vector<64x16xbf16>, vector<256x16xf32> -> vector<256x16xf32>
    %c0_33 = arith.constant 0 : index
    %c640 = arith.constant 640 : index
    %64 = vector.load %arg8[%c0_33, %c640] : memref<1x768xf32, #tpu.memory_space<vmem>>, vector<1x16xf32>
    %65 = vector.broadcast %64 : vector<1x16xf32> to vector<256x16xf32>
    %66 = arith.addf %63, %65 : vector<256x16xf32>
    %67 = vector.extract_strided_slice %52 {offsets = [0, 64], sizes = [256, 16], strides = [1, 1]} : vector<256x80xf32> to vector<256x16xf32>
    %68 = arith.negf %66 : vector<256x16xf32>
    %69 = math.exp %68 : vector<256x16xf32>
    %cst_34 = arith.constant 1.000000e+00 : f32
    %70 = vector.broadcast %cst_34 : f32 to vector<256x16xf32>
    %71 = arith.addf %70, %69 : vector<256x16xf32>
    %72 = arith.divf %70, %71 : vector<256x16xf32>
    %73 = arith.mulf %72, %67 : vector<256x16xf32>
    %cst_35 = arith.constant 0.000000e+00 : f32
    %74 = vector.broadcast %cst_35 : f32 to vector<256x112xf32>
    %75 = tpu.concatenate %73, %74 in 1 : vector<256x16xf32>, vector<256x112xf32> -> vector<256x128xf32>
    %c0_36 = arith.constant 0 : index
    %c0_37 = arith.constant 0 : index
    %76 = vector.load %arg9[%c0_36, %c0_37] : memref<256x128xf32, #tpu.memory_space<vmem>>, vector<256x128xf32>
    tpu.vector_store %arg9[%c0_36, %c0_37], %75 {strides = array<i32>} : memref<256x128xf32, #tpu.memory_space<vmem>>, vector<256x128xf32>,
    return
  }
  func.func @transform_0(%arg0: i32) -> (i32, i32) {
    %c0_i32 = arith.constant 0 : i32
    %c0_i32_0 = arith.constant 0 : i32
    return %arg0, %c0_i32 : i32, i32
  }
  func.func @transform_1(%arg0: i32) -> (i32, i32) {
    %c0_i32 = arith.constant 0 : i32
    %c0_i32_0 = arith.constant 0 : i32
    %c0_i32_1 = arith.constant 0 : i32
    return %c0_i32, %c0_i32_0 : i32, i32
  }
  func.func @transform_2(%arg0: i32) -> (i32, i32) {
    %c0_i32 = arith.constant 0 : i32
    %c0_i32_0 = arith.constant 0 : i32
    %c0_i32_1 = arith.constant 0 : i32
    return %c0_i32, %c0_i32_0 : i32, i32
  }
  func.func @transform_3(%arg0: i32) -> (i32, i32) {
    %c0_i32 = arith.constant 0 : i32
    %c0_i32_0 = arith.constant 0 : i32
    %c0_i32_1 = arith.constant 0 : i32
    return %c0_i32, %c0_i32_0 : i32, i32
  }
  func.func @transform_4(%arg0: i32) -> (i32, i32) {
    %c0_i32 = arith.constant 0 : i32
    %c0_i32_0 = arith.constant 0 : i32
    %c0_i32_1 = arith.constant 0 : i32
    return %c0_i32, %c0_i32_0 : i32, i32
  }
  func.func @transform_5(%arg0: i32) -> (i32, i32) {
    %c0_i32 = arith.constant 0 : i32
    %c0_i32_0 = arith.constant 0 : i32
    %c0_i32_1 = arith.constant 0 : i32
    return %c0_i32, %c0_i32_0 : i32, i32
  }
  func.func @transform_6(%arg0: i32) -> (i32, i32) {
    %c0_i32 = arith.constant 0 : i32
    %c0_i32_0 = arith.constant 0 : i32
    %c0_i32_1 = arith.constant 0 : i32
    return %c0_i32, %c0_i32_0 : i32, i32
  }
  func.func @transform_7(%arg0: i32) -> (i32, i32) {
    %c0_i32 = arith.constant 0 : i32
    %c0_i32_0 = arith.constant 0 : i32
    %c0_i32_1 = arith.constant 0 : i32
    return %c0_i32, %c0_i32_0 : i32, i32
  }
  func.func @transform_8(%arg0: i32) -> (i32, i32) {
    %c0_i32 = arith.constant 0 : i32
    %c0_i32_0 = arith.constant 0 : i32
    return %arg0, %c0_i32 : i32, i32
  }
}

</mosaic_0001>

<bundles_post_ra>
// kernel: pepnet_forward.1
= control target key start
LH: loop header
LB: loop body
LE: loop exit
PB: predicated region body
PF: predicated region fallthrough
CT: control target
= control target key end

     0   :  { %s4093_s27 = smov 0   ;;  %s5298_s0 = inlined_call_operand.vmem [shape: f32[2048,48], index: 0, kind: input, shape index: {}]   ;;  %s5299_s1 = inlined_call_operand.vmem [shape: bf16[32,32], index: 1, kind: input, shape index: {}]   ;;  %s5300_s2 = inlined_call_operand.vmem [shape: bf16[32,16], index: 2, kind: input, shape index: {}]   ;;  %s5301_s3 = inlined_call_operand.vmem [shape: bf16[16,64], index: 3, kind: input, shape index: {}]   ;;  %s5302_s4 = inlined_call_operand.vmem [shape: bf16[16,128], index: 4, kind: input, shape index: {}]   ;;  %s5303_s5 = inlined_call_operand.vmem [shape: bf16[64,80], index: 5, kind: input, shape index: {}]   ;;  %s5304_s6 = inlined_call_operand.vmem [shape: bf16[64,16], index: 6, kind: input, shape index: {}]   ;;  %s5305_s7 = inlined_call_operand.vmem [shape: f32[1,768], index: 7, kind: input, shape index: {}]   ;;  %s5306_s8 = inlined_call_operand.vmem [shape: f32[2048,128], index: 8, kind: output, shape index: {}]  }
   0x1 LB: > { %s3139_s28 = sadd.s32 4294967295, %s4043_s27   ;;  %p3143_p0 = scmp.ge.s32.totalorder %s4043_s27, 1  ;;  %s4043_s27 = sphi %s4093_s27, %s18_s27  }
   0x2   : > { %p263_p1 = scmp.lt.s32.totalorder %s4043_s27, 9 }
   0x4   : > { %p264_p2 = pnand %p3143_p0, %p263_p1 }
   0x5   : > { %v3639_v0 = vld [vmem:[%s5299_s1] sm:$0xff] (!%p264_p2)   ;;  %s3144_s9 = sshll.u32 (!%p264_p2), %s3139_s28, 5  ;;  %v3640_v1 = vld [vmem:[%s5299_s1 + $0x8] sm:$0xff] (!%p264_p2)   ;;  %vm381_vm0 = vcmask (!%p264_p2), 261120   ;;  %s4045_s24 = smov (!%p264_p2), 112   ;;  %vm1249_vm1 = vcmask (!%p264_p2), 130048  }
   0x6   : > { %267 = sbr.rel (%p264_p2) target bundleno = 1518 (0x5ee), region = 52  ;;  %p298_p3 = scmp.lt.s32.totalorder (!%p264_p2), %s3144_s9, 255  ;;  %3408 = vmatprep.subr.bf16.mxu0 (!%p264_p2), %v3639_v0  ;;  %v3641_v50 = vld [vmem:[%s5300_s2] sm:$0xff] (!%p264_p2)   ;;  %v3642_v51 = vld [vmem:[%s5300_s2 + $0x8] sm:$0xff] (!%p264_p2)   ;;  %vm1848_vm2 = vcmask (!%p264_p2), 523264  }
   0x7   : > { %3409 = vmatpush3.bf16.msra.mxu0 (!%p264_p2), %v3639_v0  ;;  %3444 = vmatprep.subr.bf16.mxu1 (!%p264_p2), %v3641_v50  ;;  %v3643_v52 = vld [vmem:[%s5302_s4] sm:$0xff] (!%p264_p2)   ;;  %s4046_s25 = smov (!%p264_p2), 96   ;;  %s4047_s13 = smov (!%p264_p2), 64  }
   0x8   : > { %3410 = vmatprep.subr.bf16.mxu0 (!%p264_p2), %v3640_v1  ;;  %3445 = vmatpush3.bf16.msra.mxu1 (!%p264_p2), %v3641_v50  ;;  %v4321_v53 = vld [vmem:[%s5301_s3] sm:$0xff] (!%p264_p2)  }
   0x9   : > { %3446 = vmatprep.subr.bf16.mxu1 (!%p264_p2), %v3642_v51  ;;  %v4387_v54 = vld [vmem:[%s5305_s7] ss:$0 sm:$0xff] (!%p264_p2) }
   0xb   : > { %3411 = vmatpush3.bf16.msra.mxu0 (!%p264_p2), %v3640_v1 }
   0xc   : > { %3447 = vmatpush3.bf16.msra.mxu1 (!%p264_p2), %v3642_v51  ;;  %3480 = vmatprep.subr.bf16.mxu0 (!%p264_p2), %v3643_v52 }
   0xd   : > { %s5308_s9 = smov (!%p298_p3, %s3144_s9), 255  ;;  %3514 = vmatprep.subr.bf16.mxu1 %v4321_v53 }
   0xe   : > { %s3145_s12 = sshll.u32 %s5308_s9, 3 }
   0xf   : > { %s4115_s15 = scalar_lea.vmem %s5298_s0, %s3145_s12  ;;  %s5179_s19 = scalar_lea.vmem %s5306_s8, %s3145_s12 }
  0x10   : > { %v4118_v2 = vld [vmem:[%s4115_s15] sm:$0xff]  ;;  %v4121_v3 = vld [vmem:[%s4115_s15 + $0x8] sm:$0xff]  ;;  %v4124_v4 = vld [vmem:[%s4115_s15 + $0x10] sm:$0xff] }
  0x11   : > { %v4128_v5 = vpack.c.bf16 %v4121_v3, %v4118_v2  ;;  %v4131_v6 = vld [vmem:[%s4115_s15 + $0x18] sm:$0xff]  ;;  %v4134_v7 = vld [vmem:[%s4115_s15 + $0x20] sm:$0xff]  ;;  %v4137_v8 = vld [vmem:[%s4115_s15 + $0x28] sm:$0xff]  ;;  %1095 = vrot.lane.b32.xlu0 %v4118_v2, %s4045_s24 }
  0x12   : > { %v4141_v9 = vpack.c.bf16 %v4131_v6, %v4124_v4  ;;  %v4145_v10 = vpack.c.bf16 %v4137_v8, %v4134_v7  ;;  %v4154_v11 = vld [vmem:[%s4115_s15 + $0x30] sm:$0xff]  ;;  %v4157_v12 = vld [vmem:[%s4115_s15 + $0x38] sm:$0xff]  ;;  %v4160_v13 = vld [vmem:[%s4115_s15 + $0x40] sm:$0xff]  ;;  %1099 = vrot.lane.b32.xlu1 %v4124_v4, %s4045_s24 }
  0x13   : > { %3412 = vmatprep.mubr.msk.bf16.mxu0 %vm381_vm0, %v4128_v5  ;;  %v4163_v14 = vld [vmem:[%s4115_s15 + $0x48] sm:$0xff]  ;;  %v4167_v15 = vpack.c.bf16 %v4157_v12, %v4154_v11  ;;  %v4174_v17 = vld [vmem:[%s4115_s15 + $0x50] sm:$0xff]  ;;  %v4177_v18 = vld [vmem:[%s4115_s15 + $0x58] sm:$0xff] }
  0x14   : > { %3413 = vmatmul.mubr.msk.bf16.vlgmr.msra.gmra.mrb[0].mxu0 %vm381_vm0, %v4141_v9  ;;  %v4171_v16 = vpack.c.bf16 %v4163_v14, %v4160_v13  ;;  %v4182_v19 = vld [vmem:[%s4115_s15 + $0x60] sm:$0xff]  ;;  %v4187_v20 = vld [vmem:[%s4115_s15 + $0x68] sm:$0xff]  ;;  %v4191_v21 = vpack.c.bf16 %v4177_v18, %v4174_v17  ;;  %v4202_v23 = vld [vmem:[%s4115_s15 + $0x70] sm:$0xff] }
  0x15   : > { %3416 = vmatprep.mubr.msk.bf16.mxu0 %vm381_vm0, %v4145_v10  ;;  %v4195_v22 = vpack.c.bf16 %v4187_v20, %v4182_v19  ;;  %v4205_v24 = vld [vmem:[%s4115_s15 + $0x78] sm:$0xff]  ;;  %v4208_v25 = vld [vmem:[%s4115_s15 + $0x80] sm:$0xff]  ;;  %v4211_v26 = vld [vmem:[%s4115_s15 + $0x88] sm:$0xff]  ;;  %3481 = vmatpush3.bf16.msra.mxu0 %v3643_v52 }
  0x16   : > { %v4215_v27 = vpack.c.bf16 %v4205_v24, %v4202_v23  ;;  %v4219_v28 = vpack.c.bf16 %v4211_v26, %v4208_v25  ;;  %v4226_v29 = vld [vmem:[%s4115_s15 + $0x90] sm:$0xff]  ;;  %v4229_v30 = vld [vmem:[%s4115_s15 + $0x98] sm:$0xff]  ;;  %v4232_v31 = vld [vmem:[%s4115_s15 + $0xa0] sm:$0xff]  ;;  %1097 = vrot.lane.b32.xlu0 %v4121_v3, %s4045_s24 }
  0x17   : > { %v4235_v32 = vld [vmem:[%s4115_s15 + $0xa8] sm:$0xff]  ;;  %v4239_v33 = vpack.c.bf16 %v4229_v30, %v4226_v29  ;;  %v4250_v35 = vld [vmem:[%s4115_s15 + $0xb0] sm:$0xff]  ;;  %v4253_v36 = vld [vmem:[%s4115_s15 + $0xb8] sm:$0xff]  ;;  %1101 = vrot.lane.b32.xlu1 %v4131_v6, %s4045_s24 }
  0x18   : > { %v4243_v34 = vpack.c.bf16 %v4235_v32, %v4232_v31  ;;  %v4256_v37 = vld [vmem:[%s4115_s15 + $0xc0] sm:$0xff]  ;;  %v4259_v38 = vld [vmem:[%s4115_s15 + $0xc8] sm:$0xff]  ;;  %v4263_v39 = vpack.c.bf16 %v4253_v36, %v4250_v35  ;;  %v4274_v41 = vld [vmem:[%s4115_s15 + $0xd0] sm:$0xff] }
  0x19   : > { %v4267_v40 = vpack.c.bf16 %v4259_v38, %v4256_v37  ;;  %v4277_v42 = vld [vmem:[%s4115_s15 + $0xd8] sm:$0xff]  ;;  %v4280_v43 = vld [vmem:[%s4115_s15 + $0xe0] sm:$0xff]  ;;  %v4283_v44 = vld [vmem:[%s4115_s15 + $0xe8] sm:$0xff] }
  0x1a   : > { %v4287_v45 = vpack.c.bf16 %v4277_v42, %v4274_v41  ;;  %v4291_v46 = vpack.c.bf16 %v4283_v44, %v4280_v43  ;;  %v4298_v47 = vld [vmem:[%s4115_s15 + $0xf0] sm:$0xff]  ;;  %v4301_v48 = vld [vmem:[%s4115_s15 + $0xf8] sm:$0xff]  ;;  %1475 = vrot.lane.b32.xlu0 %v4128_v5, %s4046_s25 }
  0x1b   : > { %v4305_v49 = vpack.c.bf16 %v4301_v48, %v4298_v47  ;;  %1477 = vrot.lane.b32.xlu1 %v4141_v9, %s4046_s25 }
  0x1c   : > { %3417 = vmatmul.mubr.msk.bf16.gmra.mrb[4].mxu0 %vm381_vm0, %v4167_v15 }
  0x1d   : > { %3420 = vmatprep.mubr.msk.bf16.mxu0 %vm381_vm0, %v4171_v16 }
  0x1e   : > { %1103 = vrot.lane.b32.xlu0 %v4134_v7, %s4045_s24 }
  0x1f   : > { %1105 = vrot.lane.b32.xlu1 %v4137_v8, %s4045_s24 }
  0x22   : > { %1107 = vrot.lane.b32.xlu0 %v4154_v11, %s4045_s24 }
  0x23   : > { %1109 = vrot.lane.b32.xlu1 %v4157_v12, %s4045_s24 }
  0x24   : > { %3421 = vmatmul.mubr.msk.bf16.gmra.mrb[8].mxu0 %vm381_vm0, %v4191_v21 }
  0x25   : > { %3424 = vmatprep.mubr.msk.bf16.mxu0 %vm381_vm0, %v4195_v22 }
  0x26   : > { %1479 = vrot.lane.b32.xlu0 %v4145_v10, %s4046_s25 }
  0x27   : > { %1481 = vrot.lane.b32.xlu1 %v4167_v15, %s4046_s25 }
  0x2a   : > { %1111 = vrot.lane.b32.xlu0 %v4160_v13, %s4045_s24 }
  0x2b   : > { %1113 = vrot.lane.b32.xlu1 %v4163_v14, %s4045_s24 }
  0x2c   : > { %3425 = vmatmul.mubr.msk.bf16.gmra.mrb[12].mxu0 %vm381_vm0, %v4215_v27 }
  0x2d   : > { %3428 = vmatprep.mubr.msk.bf16.mxu0 %vm381_vm0, %v4219_v28 }
  0x2e   : > { %1115 = vrot.lane.b32.xlu0 %v4174_v17, %s4045_s24 }
  0x2f   : > { %1117 = vrot.lane.b32.xlu1 %v4177_v18, %s4045_s24 }
  0x32   : > { %1483 = vrot.lane.b32.xlu0 %v4171_v16, %s4046_s25 }
  0x33   : > { %1485 = vrot.lane.b32.xlu1 %v4191_v21, %s4046_s25 }
  0x34   : > { %3429 = vmatmul.mubr.msk.bf16.gmra.mrb[16].mxu0 %vm381_vm0, %v4239_v33 }
  0x35   : > { %3432 = vmatprep.mubr.msk.bf16.mxu0 %vm381_vm0, %v4243_v34 }
  0x36   : > { %1119 = vrot.lane.b32.xlu0 %v4182_v19, %s4045_s24 }
  0x37   : > { %1121 = vrot.lane.b32.xlu1 %v4187_v20, %s4045_s24 }
  0x3a   : > { %1123 = vrot.lane.b32.xlu0 %v4202_v23, %s4045_s24 }
  0x3b   : > { %1125 = vrot.lane.b32.xlu1 %v4205_v24, %s4045_s24 }
  0x3c   : > { %3433 = vmatmul.mubr.msk.bf16.gmra.mrb[20].mxu0 %vm381_vm0, %v4263_v39 }
  0x3d   : > { %3436 = vmatprep.mubr.msk.bf16.mxu0 %vm381_vm0, %v4267_v40 }
  0x3e   : > { %1487 = vrot.lane.b32.xlu0 %v4195_v22, %s4046_s25 }
  0x3f   : > { %1489 = vrot.lane.b32.xlu1 %v4215_v27, %s4046_s25 }
  0x42   : > { %1127 = vrot.lane.b32.xlu0 %v4208_v25, %s4045_s24 }
  0x43   : > { %1129 = vrot.lane.b32.xlu1 %v4211_v26, %s4045_s24 }
  0x44   : > { %3437 = vmatmul.mubr.msk.bf16.gmra.mrb[24].mxu0 %vm381_vm0, %v4287_v45 }
  0x45   : > { %3440 = vmatprep.mubr.msk.bf16.mxu0 %vm381_vm0, %v4291_v46 }
  0x46   : > { %1131 = vrot.lane.b32.xlu0 %v4226_v29, %s4045_s24 }
  0x47   : > { %1133 = vrot.lane.b32.xlu1 %v4229_v30, %s4045_s24 }
  0x4a   : > { %1491 = vrot.lane.b32.xlu0 %v4219_v28, %s4046_s25 }
  0x4b   : > { %1493 = vrot.lane.b32.xlu1 %v4239_v33, %s4046_s25 }
  0x4c   : > { %3441 = vmatmul.mubr.msk.bf16.gmra.mrb[28].mxu0 %vm381_vm0, %v4305_v49 }
  0x4e   : > { %1135 = vrot.lane.b32.xlu0 %v4232_v31, %s4045_s24 }
  0x4f   : > { %1137 = vrot.lane.b32.xlu1 %v4235_v32, %s4045_s24 }
  0x52   : > { %1139 = vrot.lane.b32.xlu0 %v4250_v35, %s4045_s24 }
  0x53   : > { %1141 = vrot.lane.b32.xlu1 %v4253_v36, %s4045_s24 }
  0x56   : > { %1495 = vrot.lane.b32.xlu0 %v4243_v34, %s4046_s25 }
  0x57   : > { %1497 = vrot.lane.b32.xlu1 %v4263_v39, %s4046_s25 }
  0x5a   : > { %1143 = vrot.lane.b32.xlu0 %v4256_v37, %s4045_s24 }
  0x5b   : > { %1145 = vrot.lane.b32.xlu1 %v4259_v38, %s4045_s24 }
  0x5e   : > { %1147 = vrot.lane.b32.xlu0 %v4274_v41, %s4045_s24 }
  0x5f   : > { %1149 = vrot.lane.b32.xlu1 %v4277_v42, %s4045_s24 }
  0x62   : > { %1499 = vrot.lane.b32.xlu0 %v4267_v40, %s4046_s25 }
  0x63   : > { %1501 = vrot.lane.b32.xlu1 %v4287_v45, %s4046_s25 }
  0x66   : > { %1151 = vrot.lane.b32.xlu0 %v4280_v43, %s4045_s24 }
  0x67   : > { %1153 = vrot.lane.b32.xlu1 %v4283_v44, %s4045_s24 }
  0x6a   : > { %1155 = vrot.lane.b32.xlu0 %v4298_v47, %s4045_s24 }
  0x6b   : > { %1157 = vrot.lane.b32.xlu1 %v4301_v48, %s4045_s24 }
  0x6e   : > { %1503 = vrot.lane.b32.xlu0 %v4291_v46, %s4046_s25 }
  0x6f   : > { %1505 = vrot.lane.b32.xlu1 %v4305_v49, %s4046_s25 }
  0xe7   : > { %v3414_v55 = vpop.f32.mrb[0].mxu0 }
  0xe8   : > { %v473_v56 = vadd.f32 %v3414_v55, %v4387_v54  ;;  %v464_v57 = vpop.f32.mrb[1].mxu0 }
  0xe9   : > { %v465_v58 = vadd.f32 %v4387_v54, %v464_v57  ;;  %v3415_v59 = vpop.f32.mrb[2].mxu0 }
  0xea   : > { %v476_v60 = vadd.f32 %v3415_v59, %v4387_v54  ;;  %v467_v61 = vpop.f32.mrb[3].mxu0  ;;  %v593_v63 = vmax.f32 %v473_v56, 0.0 }
  0xeb   : > { %v468_v62 = vadd.f32 %v4387_v54, %v467_v61  ;;  %v591_v1 = vmax.f32 %v465_v58, 0.0 }
  0xec   : > { %v594_v0 = vmax.f32 %v476_v60, 0.0 }
  0xed   : > { %v592_v2 = vmax.f32 %v468_v62, 0.0 }
  0xee   : > { %v624_v3 = vpack.c.bf16 %v594_v0, %v593_v63 }
  0xef   : > { %v3418_v4 = vpop.f32.mrb[4].mxu0  ;;  %v623_v5 = vpack.c.bf16 %v592_v2, %v591_v1 }
  0xf0   : > { %v489_v6 = vadd.f32 %v3418_v4, %v4387_v54  ;;  %v480_v7 = vpop.f32.mrb[5].mxu0 }
  0xf1   : > { %v481_v8 = vadd.f32 %v4387_v54, %v480_v7  ;;  %v3419_v9 = vpop.f32.mrb[6].mxu0  ;;  %3448 = vmatprep.mubr.msk.bf16.mxu1 %vm381_vm0, %v623_v5 }
  0xf2   : > { %v492_v10 = vadd.f32 %v3419_v9, %v4387_v54  ;;  %v483_v11 = vpop.f32.mrb[7].mxu0  ;;  %3449 = vmatmul.mubr.msk.bf16.vlgmr.msra.gmra.mrb[0].mxu1 %vm381_vm0, %v624_v3  ;;  %v597_v13 = vmax.f32 %v489_v6, 0.0 }
  0xf3   : > { %v484_v12 = vadd.f32 %v4387_v54, %v483_v11  ;;  %3515 = vmatpush3.bf16.msra.mxu1 %v4321_v53  ;;  %v595_v15 = vmax.f32 %v481_v8, 0.0 }
  0xf4   : > { %v598_v14 = vmax.f32 %v492_v10, 0.0 }
  0xf5   : > { %v596_v16 = vmax.f32 %v484_v12, 0.0 }
  0xf6   : > { %v626_v17 = vpack.c.bf16 %v598_v14, %v597_v13 }
  0xf7   : > { %v625_v18 = vpack.c.bf16 %v596_v16, %v595_v15  ;;  %v3422_v19 = vpop.f32.mrb[8].mxu0 }
  0xf8   : > { %v505_v20 = vadd.f32 %v3422_v19, %v4387_v54  ;;  %v496_v21 = vpop.f32.mrb[9].mxu0 }
  0xf9   : > { %v497_v22 = vadd.f32 %v4387_v54, %v496_v21  ;;  %v3423_v23 = vpop.f32.mrb[10].mxu0  ;;  %3452 = vmatprep.mubr.msk.bf16.mxu1 %vm381_vm0, %v625_v18 }
  0xfa   : > { %v508_v24 = vadd.f32 %v3423_v23, %v4387_v54  ;;  %v499_v25 = vpop.f32.mrb[11].mxu0  ;;  %3453 = vmatmul.mubr.msk.bf16.gmra.mrb[4].mxu1 %vm381_vm0, %v626_v17  ;;  %v601_v27 = vmax.f32 %v505_v20, 0.0 }
  0xfb   : > { %v500_v26 = vadd.f32 %v4387_v54, %v499_v25  ;;  %v599_v29 = vmax.f32 %v497_v22, 0.0 }
  0xfc   : > { %v602_v28 = vmax.f32 %v508_v24, 0.0 }
  0xfd   : > { %v600_v30 = vmax.f32 %v500_v26, 0.0 }
  0xfe   : > { %v628_v31 = vpack.c.bf16 %v602_v28, %v601_v27 }
  0xff   : > { %v627_v32 = vpack.c.bf16 %v600_v30, %v599_v29  ;;  %v3426_v33 = vpop.f32.mrb[12].mxu0 }
 0x100   : > { %v521_v34 = vadd.f32 %v3426_v33, %v4387_v54  ;;  %v512_v35 = vpop.f32.mrb[13].mxu0 }
 0x101   : > { %v513_v36 = vadd.f32 %v4387_v54, %v512_v35  ;;  %v3427_v37 = vpop.f32.mrb[14].mxu0  ;;  %3456 = vmatprep.mubr.msk.bf16.mxu1 %vm381_vm0, %v627_v32 }
 0x102   : > { %v524_v38 = vadd.f32 %v3427_v37, %v4387_v54  ;;  %v515_v39 = vpop.f32.mrb[15].mxu0  ;;  %3457 = vmatmul.mubr.msk.bf16.gmra.mrb[8].mxu1 %vm381_vm0, %v628_v31  ;;  %v605_v41 = vmax.f32 %v521_v34, 0.0 }
 0x103   : > { %v516_v40 = vadd.f32 %v4387_v54, %v515_v39  ;;  %v603_v43 = vmax.f32 %v513_v36, 0.0 }
 0x104   : > { %v606_v42 = vmax.f32 %v524_v38, 0.0 }
 0x105   : > { %v604_v44 = vmax.f32 %v516_v40, 0.0  ;;  %v4474_v40 = vpop.permute.xlu0 %1095 }
 0x106   : > { %v630_v45 = vpack.c.bf16 %v606_v42, %v605_v41  ;;  %v4476_v41 = vpop.permute.xlu1 %1099 }
 0x107   : > { %v629_v50 = vpack.c.bf16 %v604_v44, %v603_v43  ;;  %v3430_v51 = vpop.f32.mrb[16].mxu0 }
 0x108   : > { %v537_v52 = vadd.f32 %v3430_v51, %v4387_v54  ;;  %v528_v53 = vpop.f32.mrb[17].mxu0 }
 0x109   : > { %v529_v47 = vadd.f32 %v4387_v54, %v528_v53  ;;  %v3431_v55 = vpop.f32.mrb[18].mxu0  ;;  %3460 = vmatprep.mubr.msk.bf16.mxu1 %vm381_vm0, %v629_v50  ;;  %v4478_v42 = vpop.permute.xlu0 %1097 }
 0x10a   : > { %v540_v48 = vadd.f32 %v3431_v55, %v4387_v54  ;;  %v531_v56 = vpop.f32.mrb[19].mxu0  ;;  %3461 = vmatmul.mubr.msk.bf16.gmra.mrb[12].mxu1 %vm381_vm0, %v630_v45  ;;  %v609_v58 = vmax.f32 %v537_v52, 0.0  ;;  %v4480_v43 = vpop.permute.xlu1 %1101 }
 0x10b   : > { %v532_v57 = vadd.f32 %v4387_v54, %v531_v56  ;;  %v607_v59 = vmax.f32 %v529_v47, 0.0 }
 0x10c   : > { %v610_v46 = vmax.f32 %v540_v48, 0.0 }
 0x10d   : > { %v608_v60 = vmax.f32 %v532_v57, 0.0  ;;  %v1476_v44 = vpop.permute.xlu0 %1475 }
 0x10e   : > { %v632_v49 = vpack.c.bf16 %v610_v46, %v609_v58 }
 0x10f   : > { %v631_v61 = vpack.c.bf16 %v608_v60, %v607_v59  ;;  %v3434_v62 = vpop.f32.mrb[20].mxu0 }
 0x110   : > { %v553_v63 = vadd.f32 %v3434_v62, %v4387_v54  ;;  %v544_v0 = vpop.f32.mrb[21].mxu0 }
 0x111   : > { %v545_v1 = vadd.f32 %v4387_v54, %v544_v0  ;;  %v3435_v2 = vpop.f32.mrb[22].mxu0  ;;  %3464 = vmatprep.mubr.msk.bf16.mxu1 %vm381_vm0, %v631_v61  ;;  %v4484_v45 = vpop.permute.xlu0 %1103 }
 0x112   : > { %v556_v3 = vadd.f32 %v3435_v2, %v4387_v54  ;;  %v547_v4 = vpop.f32.mrb[23].mxu0  ;;  %3465 = vmatmul.mubr.msk.bf16.gmra.mrb[16].mxu1 %vm381_vm0, %v632_v49  ;;  %v613_v6 = vmax.f32 %v553_v63, 0.0 }
 0x113   : > { %v548_v5 = vadd.f32 %v4387_v54, %v547_v4  ;;  %v611_v8 = vmax.f32 %v545_v1, 0.0 }
 0x114   : > { %v614_v7 = vmax.f32 %v556_v3, 0.0 }
 0x115   : > { %v612_v9 = vmax.f32 %v548_v5, 0.0  ;;  %v4488_v51 = vpop.permute.xlu0 %1107 }
 0x116   : > { %v634_v10 = vpack.c.bf16 %v614_v7, %v613_v6 }
 0x117   : > { %v633_v11 = vpack.c.bf16 %v612_v9, %v611_v8  ;;  %v3438_v12 = vpop.f32.mrb[24].mxu0 }
 0x118   : > { %v569_v13 = vadd.f32 %v3438_v12, %v4387_v54  ;;  %v560_v14 = vpop.f32.mrb[25].mxu0 }
 0x119   : > { %v561_v15 = vadd.f32 %v4387_v54, %v560_v14  ;;  %v3439_v16 = vpop.f32.mrb[26].mxu0  ;;  %3468 = vmatprep.mubr.msk.bf16.mxu1 %vm381_vm0, %v633_v11  ;;  %v1480_v53 = vpop.permute.xlu0 %1479 }
 0x11a   : > { %v572_v17 = vadd.f32 %v3439_v16, %v4387_v54  ;;  %v563_v18 = vpop.f32.mrb[27].mxu0  ;;  %3469 = vmatmul.mubr.msk.bf16.gmra.mrb[20].mxu1 %vm381_vm0, %v634_v10  ;;  %v617_v20 = vmax.f32 %v569_v13, 0.0 }
 0x11b   : > { %v564_v19 = vadd.f32 %v4387_v54, %v563_v18  ;;  %v615_v22 = vmax.f32 %v561_v15, 0.0 }
 0x11c   : > { %v618_v21 = vmax.f32 %v572_v17, 0.0 }
 0x11d   : > { %v616_v23 = vmax.f32 %v564_v19, 0.0  ;;  %v4494_v55 = vpop.permute.xlu0 %1111 }
 0x11e   : > { %v636_v24 = vpack.c.bf16 %v618_v21, %v617_v20 }
 0x11f   : > { %v635_v25 = vpack.c.bf16 %v616_v23, %v615_v22  ;;  %v3442_v26 = vpop.f32.mrb[28].mxu0 }
 0x120   : > { %v585_v27 = vadd.f32 %v3442_v26, %v4387_v54  ;;  %v576_v28 = vpop.f32.mrb[29].mxu0  ;;  %v4567_v26 = vld [vmem:[%s5305_s7 + $0x1] ss:$0 sm:$0xff] }
 0x121   : > { %v577_v29 = vadd.f32 %v4387_v54, %v576_v28  ;;  %v3443_v30 = vpop.f32.mrb[30].mxu0  ;;  %3472 = vmatprep.mubr.msk.bf16.mxu1 %vm381_vm0, %v635_v25  ;;  %v4498_v56 = vpop.permute.xlu0 %1115  ;;  %v4560_v25 = vld [vmem:[%s5303_s5] sm:$0xff]  }
 0x122   : > { %v588_v31 = vadd.f32 %v3443_v30, %v4387_v54  ;;  %v579_v32 = vpop.f32.mrb[31].mxu0  ;;  %3473 = vmatmul.mubr.msk.bf16.gmra.mrb[24].mxu1 %vm381_vm0, %v636_v24  ;;  %v621_v34 = vmax.f32 %v585_v27, 0.0  ;;  %v3242_v24 = vld [vmem:[%s5305_s7 + $0x4] ss:$0 sm:$0xff]  ;;  %3548 = vmatprep.subr.bf16.mxu0 %v4560_v25 }
 0x123   : > { %v580_v33 = vadd.f32 %v4387_v54, %v579_v32  ;;  %v619_v36 = vmax.f32 %v577_v29, 0.0  ;;  %v1478_v54 = vpop.permute.xlu1 %1477  ;;  %2256 = vrot.lane.b32.xlu0 %v3242_v24, %s4047_s13 }
 0x124   : > { %v622_v35 = vmax.f32 %v588_v31, 0.0 }
 0x125   : > { %v620_v37 = vmax.f32 %v580_v33, 0.0  ;;  %v1484_v58 = vpop.permute.xlu0 %1483 }
 0x126   : > { %v638_v38 = vpack.c.bf16 %v622_v35, %v621_v34 }
 0x127   : > { %v637_v39 = vpack.c.bf16 %v620_v37, %v619_v36  ;;  %v4486_v50 = vpop.permute.xlu1 %1105 }
 0x129   : > { %3476 = vmatprep.mubr.msk.bf16.mxu1 %vm381_vm0, %v637_v39  ;;  %v4504_v59 = vpop.permute.xlu0 %1119 }
 0x12a   : > { %3477 = vmatmul.mubr.msk.bf16.gmra.mrb[28].mxu1 %vm381_vm0, %v638_v38 }
 0x12b   : > { %3516 = vmatprep.mubr.msk.bf16.mxu1 %vm1249_vm1, %v1476_v44  ;;  %v4490_v52 = vpop.permute.xlu1 %1109 }
 0x12d   : > { %v4508_v49 = vpop.permute.xlu0 %1123 }
 0x12f   : > { %v1482_v47 = vpop.permute.xlu1 %1481 }
 0x131   : > { %v1488_v62 = vpop.permute.xlu0 %1487 }
 0x132   : > { %3517 = vmatmul.mubr.msk.bf16.vlgmr.msra.gmra.mrb[32].mxu1 %vm1249_vm1, %v1478_v54 }
 0x133   : > { %3520 = vmatprep.mubr.msk.bf16.mxu1 %vm1249_vm1, %v1480_v53  ;;  %v4496_v48 = vpop.permute.xlu1 %1113 }
 0x135   : > { %v4514_v0 = vpop.permute.xlu0 %1127 }
 0x137   : > { %v4500_v57 = vpop.permute.xlu1 %1117 }
 0x139   : > { %v4518_v2 = vpop.permute.xlu0 %1131 }
 0x13a   : > { %3521 = vmatmul.mubr.msk.bf16.gmra.mrb[36].mxu1 %vm1249_vm1, %v1482_v47 }
 0x13b   : > { %3524 = vmatprep.mubr.msk.bf16.mxu1 %vm1249_vm1, %v1484_v58  ;;  %v1486_v46 = vpop.permute.xlu1 %1485 }
 0x13d   : > { %v1492_v4 = vpop.permute.xlu0 %1491 }
 0x13f   : > { %v4506_v60 = vpop.permute.xlu1 %1121 }
 0x141   : > { %v4524_v6 = vpop.permute.xlu0 %1135 }
 0x142   : > { %3525 = vmatmul.mubr.msk.bf16.gmra.mrb[40].mxu1 %vm1249_vm1, %v1486_v46 }
 0x143   : > { %v4510_v61 = vpop.permute.xlu1 %1125  ;;  %3528 = vmatprep.mubr.msk.bf16.mxu1 %vm1249_vm1, %v1488_v62 }
 0x145   : > { %v4528_v8 = vpop.permute.xlu0 %1139 }
 0x147   : > { %v1490_v63 = vpop.permute.xlu1 %1489 }
 0x149   : > { %v1496_v10 = vpop.permute.xlu0 %1495 }
 0x14a   : > { %3529 = vmatmul.mubr.msk.bf16.gmra.mrb[44].mxu1 %vm1249_vm1, %v1490_v63 }
 0x14b   : > { %v4516_v1 = vpop.permute.xlu1 %1129  ;;  %3532 = vmatprep.mubr.msk.bf16.mxu1 %vm1249_vm1, %v1492_v4 }
 0x14d   : > { %v4534_v12 = vpop.permute.xlu0 %1143 }
 0x14f   : > { %v4520_v3 = vpop.permute.xlu1 %1133 }
 0x151   : > { %v4538_v14 = vpop.permute.xlu0 %1147 }
 0x153   : > { %v1494_v5 = vpop.permute.xlu1 %1493 }
 0x154   : > { %3533 = vmatmul.mubr.msk.bf16.gmra.mrb[48].mxu1 %vm1249_vm1, %v1494_v5 }
 0x155   : > { %3536 = vmatprep.mubr.msk.bf16.mxu1 %vm1249_vm1, %v1496_v10  ;;  %v1500_v16 = vpop.permute.xlu0 %1499 }
 0x157   : > { %v4526_v7 = vpop.permute.xlu1 %1137 }
 0x159   : > { %v4544_v18 = vpop.permute.xlu0 %1151 }
 0x15b   : > { %v4530_v9 = vpop.permute.xlu1 %1141 }
 0x15d   : > { %v4548_v20 = vpop.permute.xlu0 %1155 }
 0x15f   : > { %v1498_v11 = vpop.permute.xlu1 %1497 }
 0x160   : > { %3537 = vmatmul.mubr.msk.bf16.gmra.mrb[52].mxu1 %vm1249_vm1, %v1498_v11 }
 0x161   : > { %3540 = vmatprep.mubr.msk.bf16.mxu1 %vm1249_vm1, %v1500_v16  ;;  %v1504_v22 = vpop.permute.xlu0 %1503 }
 0x163   : > { %v4536_v13 = vpop.permute.xlu1 %1145 }
 0x167   : > { %v4540_v15 = vpop.permute.xlu1 %1149 }
 0x16b   : > { %v1502_v17 = vpop.permute.xlu1 %1501 }
 0x16c   : > { %3541 = vmatmul.mubr.msk.bf16.gmra.mrb[56].mxu1 %vm1249_vm1, %v1502_v17 }
 0x16d   : > { %3544 = vmatprep.mubr.msk.bf16.mxu1 %vm1249_vm1, %v1504_v22 }
 0x16f   : > { %v4546_v19 = vpop.permute.xlu1 %1153 }
 0x173   : > { %v4550_v21 = vpop.permute.xlu1 %1157 }
 0x177   : > { %v1506_v23 = vpop.permute.xlu1 %1505 }
 0x178   : > { %3545 = vmatmul.mubr.msk.bf16.gmra.mrb[60].mxu1 %vm1249_vm1, %v1506_v23 }
 0x1c5   : > { %v3450_v27 = vpop.f32.mrb[0].mxu1 }
 0x1c6   : > { %v753_v28 = vadd.f32 %v3450_v27, %v4567_v26  ;;  %v744_v29 = vpop.f32.mrb[1].mxu1 }
 0x1c7   : > { %v745_v30 = vadd.f32 %v4567_v26, %v744_v29  ;;  %v3451_v31 = vpop.f32.mrb[2].mxu1 }
 0x1c8   : > { %v873_v32 = vsub.f32 0.0, %v753_v28  ;;  %v756_v33 = vadd.f32 %v3451_v31, %v4567_v26  ;;  %v747_v34 = vpop.f32.mrb[3].mxu1 }
 0x1c9   : > { %v871_v35 = vsub.f32 0.0, %v745_v30  ;;  %v748_v36 = vadd.f32 %v4567_v26, %v747_v34 }
 0x1ca   : > { %v907_v37 = vmul.f32 1.442695, %v873_v32  ;;  %v874_v38 = vsub.f32 0.0, %v756_v33 }
 0x1cb   : > { %v903_v39 = vmul.f32 1.442695, %v871_v35  ;;  %v872_v44 = vsub.f32 0.0, %v748_v36 }
 0x1cc   : > { %3653 = vpow2.f32 %v907_v37  ;;  %v909_v54 = vmul.f32 1.442695, %v874_v38 }
 0x1cd   : > { %3655 = vpow2.f32 %v903_v39  ;;  %v905_v53 = vmul.f32 1.442695, %v872_v44  ;;  %v3454_v47 = vpop.f32.mrb[4].mxu1 }
 0x1ce   : > { %3657 = vpow2.f32 %v909_v54  ;;  %v769_v58 = vadd.f32 %v3454_v47, %v4567_v26  ;;  %v760_v46 = vpop.f32.mrb[5].mxu1 }
 0x1cf   : > { %3659 = vpow2.f32 %v905_v53  ;;  %v761_v62 = vadd.f32 %v4567_v26, %v760_v46  ;;  %v3455_v63 = vpop.f32.mrb[6].mxu1 }
 0x1d0   : > { %v877_v4 = vsub.f32 0.0, %v769_v58  ;;  %v772_v5 = vadd.f32 %v3455_v63, %v4567_v26  ;;  %v763_v10 = vpop.f32.mrb[7].mxu1 }
 0x1d1   : > { %v875_v11 = vsub.f32 0.0, %v761_v62  ;;  %v764_v16 = vadd.f32 %v4567_v26, %v763_v10 }
 0x1d2   : > { %v915_v17 = vmul.f32 1.442695, %v877_v4  ;;  %v878_v22 = vsub.f32 0.0, %v772_v5 }
 0x1d3   : > { %v911_v23 = vmul.f32 1.442695, %v875_v11  ;;  %v876_v24 = vsub.f32 0.0, %v764_v16 }
 0x1d4   : > { %3661 = vpow2.f32 %v915_v17  ;;  %v917_v27 = vmul.f32 1.442695, %v878_v22 }
 0x1d5   : > { %3663 = vpow2.f32 %v911_v23  ;;  %v913_v28 = vmul.f32 1.442695, %v876_v24  ;;  %v3458_v29 = vpop.f32.mrb[8].mxu1 }
 0x1d6   : > { %v3654_v30 = vpop.eup %3653  ;;  %3665 = vpow2.f32 %v917_v27  ;;  %v785_v31 = vadd.f32 %v3458_v29, %v4567_v26  ;;  %v776_v32 = vpop.f32.mrb[9].mxu1 }
 0x1d7   : > { %v3656_v33 = vpop.eup %3655  ;;  %v969_v34 = vadd.f32 1.0, %v3654_v30  ;;  %3667 = vpow2.f32 %v913_v28  ;;  %v777_v35 = vadd.f32 %v4567_v26, %v776_v32  ;;  %v3459_v36 = vpop.f32.mrb[10].mxu1 }
 0x1d8   : > { %v3658_v37 = vpop.eup %3657  ;;  %v967_v38 = vadd.f32 1.0, %v3656_v33  ;;  %v881_v39 = vsub.f32 0.0, %v785_v31  ;;  %v788_v44 = vadd.f32 %v3459_v36, %v4567_v26  ;;  %v779_v54 = vpop.f32.mrb[11].mxu1 }
 0x1d9   : > { %v3660_v53 = vpop.eup %3659  ;;  %3669 = vrcp.f32 %v969_v34  ;;  %v970_v47 = vadd.f32 1.0, %v3658_v37  ;;  %v879_v58 = vsub.f32 0.0, %v777_v35  ;;  %v780_v46 = vadd.f32 %v4567_v26, %v779_v54 }
 0x1da   : > { %3671 = vrcp.f32 %v967_v38  ;;  %v968_v62 = vadd.f32 1.0, %v3660_v53  ;;  %v923_v63 = vmul.f32 1.442695, %v881_v39  ;;  %v882_v4 = vsub.f32 0.0, %v788_v44 }
 0x1db   : > { %3673 = vrcp.f32 %v970_v47  ;;  %v919_v5 = vmul.f32 1.442695, %v879_v58  ;;  %v880_v10 = vsub.f32 0.0, %v780_v46 }
 0x1dc   : > { %3675 = vrcp.f32 %v968_v62  ;;  %v925_v11 = vmul.f32 1.442695, %v882_v4 }
 0x1dd   : > { %3677 = vpow2.f32 %v923_v63  ;;  %v921_v16 = vmul.f32 1.442695, %v880_v10  ;;  %v3462_v17 = vpop.f32.mrb[12].mxu1 }
 0x1de   : > { %v3662_v22 = vpop.eup %3661  ;;  %3679 = vpow2.f32 %v919_v5  ;;  %v801_v23 = vadd.f32 %v3462_v17, %v4567_v26  ;;  %v792_v24 = vpop.f32.mrb[13].mxu1 }
 0x1df   : > { %v3664_v27 = vpop.eup %3663  ;;  %v973_v28 = vadd.f32 1.0, %v3662_v22  ;;  %3681 = vpow2.f32 %v925_v11  ;;  %v793_v29 = vadd.f32 %v4567_v26, %v792_v24  ;;  %v3463_v30 = vpop.f32.mrb[14].mxu1 }
 0x1e0   : > { %v3666_v31 = vpop.eup %3665  ;;  %v971_v32 = vadd.f32 1.0, %v3664_v27  ;;  %3683 = vpow2.f32 %v921_v16  ;;  %v885_v33 = vsub.f32 0.0, %v801_v23  ;;  %v804_v34 = vadd.f32 %v3463_v30, %v4567_v26  ;;  %v795_v35 = vpop.f32.mrb[15].mxu1 }
 0x1e1   : > { %v3668_v36 = vpop.eup %3667  ;;  %v974_v37 = vadd.f32 1.0, %v3666_v31  ;;  %3685 = vrcp.f32 %v973_v28  ;;  %v883_v38 = vsub.f32 0.0, %v793_v29  ;;  %v796_v39 = vadd.f32 %v4567_v26, %v795_v35 }
 0x1e2   : > { %v972_v44 = vadd.f32 1.0, %v3668_v36  ;;  %3687 = vrcp.f32 %v971_v32  ;;  %v931_v54 = vmul.f32 1.442695, %v885_v33  ;;  %v886_v53 = vsub.f32 0.0, %v804_v34 }
 0x1e3   : > { %v3670_v47 = vpop.eup %3669  ;;  %3689 = vrcp.f32 %v974_v37  ;;  %v927_v58 = vmul.f32 1.442695, %v883_v38  ;;  %v884_v46 = vsub.f32 0.0, %v796_v39 }
 0x1e4   : > { %v3672_v62 = vpop.eup %3671  ;;  %v1033_v63 = vmul.f32 2.0, %v3670_v47  ;;  %3691 = vrcp.f32 %v972_v44  ;;  %v933_v4 = vmul.f32 1.442695, %v886_v53 }
 0x1e5   : > { %v3674_v5 = vpop.eup %3673  ;;  %v1031_v10 = vmul.f32 2.0, %v3672_v62  ;;  %3693 = vpow2.f32 %v931_v54  ;;  %v929_v11 = vmul.f32 1.442695, %v884_v46  ;;  %v3466_v16 = vpop.f32.mrb[16].mxu1 }
 0x1e6   : > { %v3676_v17 = vpop.eup %3675  ;;  %v1193_v22 = vmul.f32 %v4476_v41, %v1033_v63  ;;  %v1034_v23 = vmul.f32 2.0, %v3674_v5  ;;  %3695 = vpow2.f32 %v927_v58  ;;  %v817_v24 = vadd.f32 %v3466_v16, %v4567_v26  ;;  %v808_v27 = vpop.f32.mrb[17].mxu1 }
 0x1e7   : > { %v3678_v28 = vpop.eup %3677  ;;  %v1032_v29 = vmul.f32 2.0, %v3676_v17  ;;  %v1191_v30 = vmul.f32 %v4474_v40, %v1031_v10  ;;  %3697 = vpow2.f32 %v933_v4  ;;  %v809_v31 = vadd.f32 %v4567_v26, %v808_v27  ;;  %v3467_v32 = vpop.f32.mrb[18].mxu1 }
 0x1e8   : > { %v3680_v33 = vpop.eup %3679  ;;  %v1194_v34 = vmul.f32 %v4480_v43, %v1034_v23  ;;  %v977_v35 = vadd.f32 1.0, %v3678_v28  ;;  %3699 = vpow2.f32 %v929_v11  ;;  %v889_v36 = vsub.f32 0.0, %v817_v24  ;;  %v811_v41 = vpop.f32.mrb[19].mxu1  ;;  %v3646_v11 = vld [vmem:[%s5303_s5 + $0x8] sm:$0xff]  }
 0x1e9   : > { %v3682_v37 = vpop.eup %3681  ;;  %v1192_v38 = vmul.f32 %v4478_v42, %v1032_v29  ;;  %v975_v39 = vadd.f32 1.0, %v3680_v33  ;;  %v887_v44 = vsub.f32 0.0, %v809_v31  ;;  %v820_v54 = vadd.f32 %v3467_v32, %v4567_v26 }
 0x1ea   : > { %v3684_v53 = vpop.eup %3683  ;;  %v1224_v40 = vpack.c.bf16 %v1194_v34, %v1193_v22  ;;  %v978_v47 = vadd.f32 1.0, %v3682_v37  ;;  %3701 = vrcp.f32 %v977_v35  ;;  %v939_v58 = vmul.f32 1.442695, %v889_v36 }
 0x1eb   : > { %v3686_v46 = vpop.eup %3685  ;;  %v1223_v62 = vpack.c.bf16 %v1192_v38, %v1191_v30  ;;  %v976_v63 = vadd.f32 1.0, %v3684_v53  ;;  %3703 = vrcp.f32 %v975_v39  ;;  %v935_v43 = vmul.f32 1.442695, %v887_v44  ;;  %v3647_v38 = vld [vmem:[%s5303_s5 + $0x10] sm:$0xff]  }
 0x1ec   : > { %v3688_v4 = vpop.eup %3687  ;;  %v1037_v5 = vmul.f32 2.0, %v3686_v46  ;;  %3705 = vrcp.f32 %v978_v47  ;;  %v890_v10 = vsub.f32 0.0, %v820_v54  ;;  %v812_v42 = vadd.f32 %v4567_v26, %v811_v41 }
 0x1ed   : > { %v3690_v16 = vpop.eup %3689  ;;  %v1035_v17 = vmul.f32 2.0, %v3688_v4  ;;  %3707 = vrcp.f32 %v976_v63  ;;  %v3470_v22 = vpop.f32.mrb[20].mxu1  ;;  %3482 = vmatprep.mubr.msk.bf16.mxu0 %vm1249_vm1, %v1223_v62 }
 0x1ee   : > { %v3692_v23 = vpop.eup %3691  ;;  %v1197_v24 = vmul.f32 %v4488_v51, %v1037_v5  ;;  %v1038_v27 = vmul.f32 2.0, %v3690_v16  ;;  %3709 = vpow2.f32 %v939_v58  ;;  %v941_v28 = vmul.f32 1.442695, %v890_v10  ;;  %v824_v29 = vpop.f32.mrb[21].mxu1  ;;  %3483 = vmatmul.mubr.msk.bf16.vlgmr.msra.gmra.mrb[32].mxu0 %vm1249_vm1, %v1224_v40  ;;  %v3648_v5 = vld [vmem:[%s5303_s5 + $0x18] sm:$0xff]  }
 0x1ef   : > { %v3694_v30 = vpop.eup %3693  ;;  %v1195_v31 = vmul.f32 %v4484_v45, %v1035_v17  ;;  %v1036_v32 = vmul.f32 2.0, %v3692_v23  ;;  %3711 = vpow2.f32 %v935_v43  ;;  %v888_v33 = vsub.f32 0.0, %v812_v42  ;;  %v3471_v34 = vpop.f32.mrb[22].mxu1  ;;  %3549 = vmatpush3.bf16.msra.mxu0 %v4560_v25 }
 0x1f0   : > { %v3696_v35 = vpop.eup %3695  ;;  %v1198_v36 = vmul.f32 %v4490_v52, %v1038_v27  ;;  %v981_v41 = vadd.f32 1.0, %v3694_v30  ;;  %3713 = vpow2.f32 %v941_v28  ;;  %v833_v51 = vadd.f32 %v3470_v22, %v4567_v26  ;;  %v827_v37 = vpop.f32.mrb[23].mxu1  ;;  %3550 = vmatprep.subr.bf16.mxu0 %v3646_v11 }
 0x1f1   : > { %v3698_v45 = vpop.eup %3697  ;;  %v1196_v39 = vmul.f32 %v4486_v50, %v1036_v32  ;;  %v979_v44 = vadd.f32 1.0, %v3696_v35  ;;  %v937_v54 = vmul.f32 1.442695, %v888_v33  ;;  %v825_v25 = vadd.f32 %v4567_v26, %v824_v29 }
 0x1f2   : > { %v3700_v53 = vpop.eup %3699  ;;  %v1226_v40 = vpack.c.bf16 %v1198_v36, %v1197_v24  ;;  %v982_v52 = vadd.f32 1.0, %v3698_v45  ;;  %3715 = vrcp.f32 %v981_v41  ;;  %v893_v47 = vsub.f32 0.0, %v833_v51 }
 0x1f3   : > { %v1225_v58 = vpack.c.bf16 %v1196_v39, %v1195_v31  ;;  %v980_v46 = vadd.f32 1.0, %v3700_v53  ;;  %3717 = vpow2.f32 %v937_v54  ;;  %v891_v62 = vsub.f32 0.0, %v825_v25  ;;  %3551 = vmatpush3.bf16.msra.mxu0 %v3646_v11 }
 0x1f4   : > { %v3702_v63 = vpop.eup %3701  ;;  %3719 = vrcp.f32 %v979_v44  ;;  %v947_v43 = vmul.f32 1.442695, %v893_v47  ;;  %v836_v4 = vadd.f32 %v3471_v34, %v4567_v26  ;;  %v828_v50 = vadd.f32 %v4567_v26, %v827_v37  ;;  %3552 = vmatprep.subr.bf16.mxu0 %v3647_v38 }
 0x1f5   : > { %v3704_v10 = vpop.eup %3703  ;;  %v1041_v42 = vmul.f32 2.0, %v3702_v63  ;;  %3721 = vrcp.f32 %v980_v46  ;;  %v943_v16 = vmul.f32 1.442695, %v891_v62  ;;  %v3474_v17 = vpop.f32.mrb[24].mxu1  ;;  %3486 = vmatprep.mubr.msk.bf16.mxu0 %vm1249_vm1, %v1225_v58 }
 0x1f6   : > { %v3706_v11 = vpop.eup %3705  ;;  %v1039_v22 = vmul.f32 2.0, %v3704_v10  ;;  %3723 = vpow2.f32 %v947_v43  ;;  %v894_v23 = vsub.f32 0.0, %v836_v4  ;;  %v892_v24 = vsub.f32 0.0, %v828_v50  ;;  %v840_v27 = vpop.f32.mrb[25].mxu1  ;;  %3487 = vmatmul.mubr.msk.bf16.gmra.mrb[36].mxu0 %vm1249_vm1, %v1226_v40 }
 0x1f7   : > { %v3708_v28 = vpop.eup %3707  ;;  %v1201_v29 = vmul.f32 %v4498_v56, %v1041_v42  ;;  %v1042_v30 = vmul.f32 2.0, %v3706_v11  ;;  %3725 = vrcp.f32 %v982_v52  ;;  %v849_v31 = vadd.f32 %v3474_v17, %v4567_v26  ;;  %v3475_v32 = vpop.f32.mrb[26].mxu1  ;;  %3553 = vmatpush3.bf16.msra.mxu0 %v3647_v38 }
 0x1f8   : > { %v3710_v33 = vpop.eup %3709  ;;  %v1199_v34 = vmul.f32 %v4494_v55, %v1039_v22  ;;  %v1040_v35 = vmul.f32 2.0, %v3708_v28  ;;  %3727 = vpow2.f32 %v943_v16  ;;  %v949_v36 = vmul.f32 1.442695, %v894_v23  ;;  %v843_v41 = vpop.f32.mrb[27].mxu1  ;;  %3554 = vmatprep.subr.bf16.mxu0 %v3648_v5 }
 0x1f9   : > { %v3712_v51 = vpop.eup %3711  ;;  %v1202_v37 = vmul.f32 %v4500_v57, %v1042_v30  ;;  %v985_v45 = vadd.f32 1.0, %v3710_v33  ;;  %v945_v39 = vmul.f32 1.442695, %v892_v24  ;;  %v897_v56 = vsub.f32 0.0, %v849_v31 }
 0x1fa   : > { %v3714_v44 = vpop.eup %3713  ;;  %v1200_v54 = vmul.f32 %v4496_v48, %v1040_v35  ;;  %v983_v25 = vadd.f32 1.0, %v3712_v51  ;;  %3729 = vpow2.f32 %v949_v36  ;;  %v841_v38 = vadd.f32 %v4567_v26, %v840_v27 }
 0x1fb   : > { %v1228_v53 = vpack.c.bf16 %v1202_v37, %v1201_v29  ;;  %v986_v55 = vadd.f32 1.0, %v3714_v44  ;;  %3731 = vpow2.f32 %v945_v39  ;;  %v955_v40 = vmul.f32 1.442695, %v897_v56  ;;  %3555 = vmatpush3.bf16.msra.mxu0 %v3648_v5 }
 0x1fc   : > { %v3716_v52 = vpop.eup %3715  ;;  %v1227_v47 = vpack.c.bf16 %v1200_v54, %v1199_v34  ;;  %3733 = vrcp.f32 %v983_v25  ;;  %v895_v58 = vsub.f32 0.0, %v841_v38  ;;  %v852_v57 = vadd.f32 %v3475_v32, %v4567_v26 }
 0x1fd   : > { %v3718_v46 = vpop.eup %3717  ;;  %v1045_v62 = vmul.f32 2.0, %v3716_v52  ;;  %3735 = vpow2.f32 %v955_v40  ;;  %v844_v48 = vadd.f32 %v4567_v26, %v843_v41  ;;  %v3478_v63 = vpop.f32.mrb[28].mxu1 }
 0x1fe   : > { %v3720_v43 = vpop.eup %3719  ;;  %v984_v4 = vadd.f32 1.0, %v3718_v46  ;;  %v951_v50 = vmul.f32 1.442695, %v895_v58  ;;  %v898_v10 = vsub.f32 0.0, %v852_v57  ;;  %3737 = vrcp.f32 %v985_v45  ;;  %3490 = vmatprep.mubr.msk.bf16.mxu0 %vm1249_vm1, %v1227_v47  ;;  %v856_v5 = vpop.f32.mrb[29].mxu1 }
 0x1ff   : > { %v3722_v42 = vpop.eup %3721  ;;  %v1043_v16 = vmul.f32 2.0, %v3720_v43  ;;  %v1205_v17 = vmul.f32 %v4508_v49, %v1045_v62  ;;  %v896_v11 = vsub.f32 0.0, %v844_v48  ;;  %3739 = vrcp.f32 %v986_v55  ;;  %3491 = vmatmul.mubr.msk.bf16.gmra.mrb[40].mxu0 %vm1249_vm1, %v1228_v53  ;;  %v3479_v22 = vpop.f32.mrb[30].mxu1 }
 0x200   : > { %v3724_v23 = vpop.eup %3723  ;;  %v1044_v24 = vmul.f32 2.0, %v3722_v42  ;;  %3741 = vrcp.f32 %v984_v4  ;;  %v957_v27 = vmul.f32 1.442695, %v898_v10  ;;  %v865_v28 = vadd.f32 %v3478_v63, %v4567_v26  ;;  %v859_v29 = vpop.f32.mrb[31].mxu1 }
 0x201   : > { %v3726_v30 = vpop.eup %3725  ;;  %v1203_v31 = vmul.f32 %v4504_v59, %v1043_v16  ;;  %v989_v32 = vadd.f32 1.0, %v3724_v23  ;;  %3743 = vpow2.f32 %v951_v50  ;;  %v953_v33 = vmul.f32 1.442695, %v896_v11 }
 0x202   : > { %v3728_v34 = vpop.eup %3727  ;;  %v1204_v49 = vmul.f32 %v4506_v60, %v1044_v24  ;;  %v1046_v35 = vmul.f32 2.0, %v3726_v30  ;;  %3745 = vpow2.f32 %v957_v27  ;;  %v901_v36 = vsub.f32 0.0, %v865_v28 }
 0x203   : > { %v987_v41 = vadd.f32 1.0, %v3728_v34  ;;  %3747 = vpow2.f32 %v953_v33  ;;  %v857_v51 = vadd.f32 %v4567_v26, %v856_v5  ;;  %v868_v37 = vadd.f32 %v3479_v22, %v4567_v26 }
 0x204   : > { %v3730_v45 = vpop.eup %3729  ;;  %v1229_v39 = vpack.c.bf16 %v1204_v49, %v1203_v31  ;;  %v1206_v56 = vmul.f32 %v4510_v61, %v1046_v35  ;;  %v963_v59 = vmul.f32 1.442695, %v901_v36  ;;  %v860_v44 = vadd.f32 %v4567_v26, %v859_v29 }
 0x205   : > { %v3732_v54 = vpop.eup %3731  ;;  %v899_v25 = vsub.f32 0.0, %v857_v51  ;;  %v902_v38 = vsub.f32 0.0, %v868_v37  ;;  %3749 = vrcp.f32 %v987_v41  ;;  %v990_v61 = vadd.f32 1.0, %v3730_v45 }
 0x206   : > { %v3734_v60 = vpop.eup %3733  ;;  %v1230_v53 = vpack.c.bf16 %v1206_v56, %v1205_v17  ;;  %v988_v55 = vadd.f32 1.0, %v3732_v54  ;;  %3751 = vpow2.f32 %v963_v59  ;;  %v900_v40 = vsub.f32 0.0, %v860_v44  ;;  %3494 = vmatprep.mubr.msk.bf16.mxu0 %vm1249_vm1, %v1229_v39 }
 0x207   : > { %v3736_v52 = vpop.eup %3735  ;;  %v959_v47 = vmul.f32 1.442695, %v899_v25  ;;  %v965_v58 = vmul.f32 1.442695, %v902_v38  ;;  %3753 = vrcp.f32 %v989_v32  ;;  %v1047_v62 = vmul.f32 2.0, %v3734_v60 }
 0x208   : > { %v3738_v57 = vpop.eup %3737  ;;  %v961_v46 = vmul.f32 1.442695, %v900_v40  ;;  %3755 = vrcp.f32 %v988_v55  ;;  %3495 = vmatmul.mubr.msk.bf16.gmra.mrb[44].mxu0 %vm1249_vm1, %v1230_v53  ;;  %v993_v48 = vadd.f32 1.0, %v3736_v52 }
 0x209   : > { %v3740_v26 = vpop.eup %3739  ;;  %v1049_v63 = vmul.f32 2.0, %v3738_v57  ;;  %3757 = vpow2.f32 %v959_v47  ;;  %v1207_v22 = vmul.f32 %v4514_v0, %v1047_v62 }
 0x20a   : > { %v3742_v43 = vpop.eup %3741  ;;  %v1050_v4 = vmul.f32 2.0, %v3740_v26  ;;  %3759 = vpow2.f32 %v965_v58 }
 0x20b   : > { %v3744_v50 = vpop.eup %3743  ;;  %v1048_v10 = vmul.f32 2.0, %v3742_v43  ;;  %3761 = vpow2.f32 %v961_v46  ;;  %v1209_v16 = vmul.f32 %v4518_v2, %v1049_v63 }
 0x20c   : > { %v3746_v5 = vpop.eup %3745  ;;  %v991_v42 = vadd.f32 1.0, %v3744_v50  ;;  %v1210_v17 = vmul.f32 %v4520_v3, %v1050_v4  ;;  %3763 = vrcp.f32 %v990_v61 }
 0x20d   : > { %v3748_v11 = vpop.eup %3747  ;;  %v1208_v23 = vmul.f32 %v4516_v1, %v1048_v10  ;;  %v994_v24 = vadd.f32 1.0, %v3746_v5  ;;  %3765 = vrcp.f32 %v993_v48 }
 0x20e   : > { %v992_v27 = vadd.f32 1.0, %v3748_v11  ;;  %v1232_v28 = vpack.c.bf16 %v1210_v17, %v1209_v16  ;;  %3767 = vrcp.f32 %v991_v42 }
 0x20f   : > { %v3750_v29 = vpop.eup %3749  ;;  %v1231_v30 = vpack.c.bf16 %v1208_v23, %v1207_v22  ;;  %3769 = vrcp.f32 %v994_v24 }
 0x210   : > { %v3752_v31 = vpop.eup %3751  ;;  %3771 = vrcp.f32 %v992_v27  ;;  %v1051_v33 = vmul.f32 2.0, %v3750_v29 }
 0x211   : > { %v3754_v32 = vpop.eup %3753  ;;  %v997_v2 = vadd.f32 1.0, %v3752_v31  ;;  %3498 = vmatprep.mubr.msk.bf16.mxu0 %vm1249_vm1, %v1231_v30 }
 0x212   : > { %v3756_v3 = vpop.eup %3755  ;;  %3499 = vmatmul.mubr.msk.bf16.gmra.mrb[48].mxu0 %vm1249_vm1, %v1232_v28  ;;  %v1211_v41 = vmul.f32 %v4524_v6, %v1051_v33  ;;  %v1053_v37 = vmul.f32 2.0, %v3754_v32 }
 0x213   : > { %v3758_v0 = vpop.eup %3757  ;;  %v1052_v1 = vmul.f32 2.0, %v3756_v3  ;;  %3773 = vrcp.f32 %v997_v2 }
 0x214   : > { %v3760_v34 = vpop.eup %3759  ;;  %v995_v49 = vadd.f32 1.0, %v3758_v0  ;;  %v1213_v60 = vmul.f32 %v4528_v8, %v1053_v37 }
 0x215   : > { %v3762_v35 = vpop.eup %3761  ;;  %v998_v36 = vadd.f32 1.0, %v3760_v34  ;;  %v1212_v51 = vmul.f32 %v4526_v7, %v1052_v1 }
 0x216   : > { %v3764_v45 = vpop.eup %3763  ;;  %v996_v39 = vadd.f32 1.0, %v3762_v35  ;;  %3775 = vrcp.f32 %v995_v49 }
 0x217   : > { %v3766_v56 = vpop.eup %3765  ;;  %v1233_v59 = vpack.c.bf16 %v1212_v51, %v1211_v41  ;;  %v1054_v44 = vmul.f32 2.0, %v3764_v45  ;;  %3777 = vrcp.f32 %v998_v36 }
 0x218   : > { %v3768_v54 = vpop.eup %3767  ;;  %v1057_v25 = vmul.f32 2.0, %v3766_v56  ;;  %3779 = vrcp.f32 %v996_v39 }
 0x219   : > { %v3770_v38 = vpop.eup %3769  ;;  %v1214_v53 = vmul.f32 %v4530_v9, %v1054_v44  ;;  %v1055_v55 = vmul.f32 2.0, %v3768_v54  ;;  %3502 = vmatprep.mubr.msk.bf16.mxu0 %vm1249_vm1, %v1233_v59  ;;  %v4712_v44 = vld [vmem:[%s5305_s7 + $0x2] ss:$0 sm:$0xff] }
 0x21a   : > { %v3772_v6 = vpop.eup %3771  ;;  %v1058_v7 = vmul.f32 2.0, %v3770_v38  ;;  %v1217_v47 = vmul.f32 %v4538_v14, %v1057_v25  ;;  %v3518_v14 = vpop.f32.mrb[32].mxu1 }
 0x21b   : > { %v1234_v40 = vpack.c.bf16 %v1214_v53, %v1213_v60  ;;  %v1056_v52 = vmul.f32 2.0, %v3772_v6  ;;  %v1215_v61 = vmul.f32 %v4534_v12, %v1055_v55 }
 0x21c   : > { %v1218_v58 = vmul.f32 %v4540_v15, %v1058_v7  ;;  %v1595_v15 = vpop.f32.mrb[33].mxu1 }
 0x21d   : > { %v3774_v57 = vpop.eup %3773  ;;  %v1216_v46 = vmul.f32 %v4536_v13, %v1056_v52  ;;  %3503 = vmatmul.mubr.msk.bf16.gmra.mrb[52].mxu0 %vm1249_vm1, %v1234_v40  ;;  %v3519_v13 = vpop.f32.mrb[34].mxu1 }
 0x21e   : > { %v1236_v8 = vpack.c.bf16 %v1218_v58, %v1217_v47  ;;  %v1061_v62 = vmul.f32 2.0, %v3774_v57  ;;  %v1598_v16 = vpop.f32.mrb[35].mxu1 }
 0x21f   : > { %v1235_v9 = vpack.c.bf16 %v1216_v46, %v1215_v61  ;;  %v3522_v22 = vpop.f32.mrb[36].mxu1 }
 0x220   : > { %v3776_v26 = vpop.eup %3775  ;;  %v1221_v10 = vmul.f32 %v4548_v20, %v1061_v62  ;;  %v1611_v23 = vpop.f32.mrb[37].mxu1 }
 0x221   : > { %v3778_v48 = vpop.eup %3777  ;;  %v1059_v63 = vmul.f32 2.0, %v3776_v26  ;;  %3506 = vmatprep.mubr.msk.bf16.mxu0 %vm1249_vm1, %v1235_v9  ;;  %v3523_v24 = vpop.f32.mrb[38].mxu1 }
 0x222   : > { %v3780_v43 = vpop.eup %3779  ;;  %v1062_v4 = vmul.f32 2.0, %v3778_v48  ;;  %v1614_v20 = vpop.f32.mrb[39].mxu1 }
 0x223   : > { %v1060_v50 = vmul.f32 2.0, %v3780_v43  ;;  %v1219_v5 = vmul.f32 %v4544_v18, %v1059_v63  ;;  %v4659_v27 = vpop.f32.mrb[40].mxu1 }
 0x224   : > { %v1222_v12 = vmul.f32 %v4550_v21, %v1062_v4  ;;  %v4661_v21 = vpop.f32.mrb[41].mxu1 }
 0x225   : > { %v1220_v42 = vmul.f32 %v4546_v19, %v1060_v50  ;;  %3507 = vmatmul.mubr.msk.bf16.gmra.mrb[56].mxu0 %vm1249_vm1, %v1236_v8  ;;  %v4663_v18 = vpop.f32.mrb[42].mxu1 }
 0x226   : > { %v1238_v17 = vpack.c.bf16 %v1222_v12, %v1221_v10  ;;  %v4665_v19 = vpop.f32.mrb[43].mxu1 }
 0x227   : > { %v1237_v11 = vpack.c.bf16 %v1220_v42, %v1219_v5  ;;  %v4667_v28 = vpop.f32.mrb[44].mxu1 }
 0x228   : > { %v4669_v29 = vpop.f32.mrb[45].mxu1 }
 0x229   : > { %3510 = vmatprep.mubr.msk.bf16.mxu0 %vm1249_vm1, %v1237_v11  ;;  %v4671_v30 = vpop.f32.mrb[46].mxu1 }
 0x22a   : > { %v4673_v31 = vpop.f32.mrb[47].mxu1 }
 0x22b   : > { %v4675_v32 = vpop.f32.mrb[48].mxu1 }
 0x22c   : > { %v4677_v2 = vpop.f32.mrb[49].mxu1 }
 0x22d   : > { %3511 = vmatmul.mubr.msk.bf16.gmra.mrb[60].mxu0 %vm1249_vm1, %v1238_v17  ;;  %v4679_v33 = vpop.f32.mrb[50].mxu1 }
 0x22e   : > { %v4681_v3 = vpop.f32.mrb[51].mxu1 }
 0x233   : > { %v4683_v0 = vpop.f32.mrb[52].mxu1 }
 0x234   : > { %v4685_v1 = vpop.f32.mrb[53].mxu1 }
 0x235   : > { %v4687_v34 = vpop.f32.mrb[54].mxu1 }
 0x236   : > { %v4689_v49 = vpop.f32.mrb[55].mxu1 }
 0x23f   : > { %v4691_v35 = vpop.f32.mrb[56].mxu1 }
 0x240   : > { %v4693_v36 = vpop.f32.mrb[57].mxu1 }
 0x241   : > { %v4695_v41 = vpop.f32.mrb[58].mxu1 }
 0x242   : > { %v4697_v51 = vpop.f32.mrb[59].mxu1 }
 0x24b   : > { %v4699_v37 = vpop.f32.mrb[60].mxu1 }
 0x24c   : > { %v4701_v45 = vpop.f32.mrb[61].mxu1 }
 0x24d   : > { %v4703_v39 = vpop.f32.mrb[62].mxu1 }
 0x24e   : > { %v4705_v56 = vpop.f32.mrb[63].mxu1 }
 0x2c1   : > { %v4707_v59 = vpop.f32.mrb[32].mxu0 }
 0x2c2   : > { %v1604_v54 = vadd.f32 %v3518_v14, %v4707_v59  ;;  %v4715_v25 = vpop.f32.mrb[33].mxu0 }
 0x2c3   : > { %v1596_v38 = vadd.f32 %v1595_v15, %v4715_v25  ;;  %v4718_v60 = vpop.f32.mrb[34].mxu0 }
 0x2c4   : > { %v1731_v53 = vadd.f32 %v4712_v44, %v1604_v54  ;;  %v1607_v55 = vadd.f32 %v3519_v13, %v4718_v60  ;;  %v4722_v6 = vpop.f32.mrb[35].mxu0 }
 0x2c5   : > { %v1729_v7 = vadd.f32 %v4712_v44, %v1596_v38  ;;  %v1599_v40 = vadd.f32 %v1598_v16, %v4722_v6 }
 0x2c6   : > { %v1732_v52 = vadd.f32 %v4712_v44, %v1607_v55  ;;  %v1763_v58 = vmax.f32 %v1731_v53, 0.0 }
 0x2c7   : > { %v1730_v47 = vadd.f32 %v4712_v44, %v1599_v40  ;;  %v1761_v61 = vmax.f32 %v1729_v7, 0.0 }
 0x2c8   : > { %v1764_v57 = vmax.f32 %v1732_v52, 0.0 }
 0x2c9   : > { %v1762_v46 = vmax.f32 %v1730_v47, 0.0  ;;  %v4728_v8 = vpop.f32.mrb[36].mxu0 }
 0x2ca   : > { %v1794_v9 = vpack.c.bf16 %v1764_v57, %v1763_v58  ;;  %v1620_v26 = vadd.f32 %v3522_v22, %v4728_v8  ;;  %v4731_v62 = vpop.f32.mrb[37].mxu0 }
 0x2cb   : > { %v1793_v48 = vpack.c.bf16 %v1762_v46, %v1761_v61  ;;  %v1612_v63 = vadd.f32 %v1611_v23, %v4731_v62  ;;  %v4734_v43 = vpop.f32.mrb[38].mxu0 }
 0x2cc   : > { %v1735_v4 = vadd.f32 %v4712_v44, %v1620_v26  ;;  %v1623_v14 = vadd.f32 %v3523_v24, %v4734_v43  ;;  %v4738_v50 = vpop.f32.mrb[39].mxu0 }
 0x2cd   : > { %v1733_v15 = vadd.f32 %v4712_v44, %v1612_v63  ;;  %v1615_v10 = vadd.f32 %v1614_v20, %v4738_v50  ;;  %3556 = vmatprep.mubr.msk.bf16.mxu0 %vm1848_vm2, %v1793_v48 }
 0x2ce   : > { %v1736_v12 = vadd.f32 %v4712_v44, %v1623_v14  ;;  %3557 = vmatmul.mubr.msk.bf16.vlgmr.msra.gmra.mrb[64].mxu0 %vm1848_vm2, %v1794_v9  ;;  %v1767_v5 = vmax.f32 %v1735_v4, 0.0 }
 0x2cf   : > { %v1734_v13 = vadd.f32 %v4712_v44, %v1615_v10  ;;  %v1765_v16 = vmax.f32 %v1733_v15, 0.0 }
 0x2d0   : > { %v1768_v42 = vmax.f32 %v1736_v12, 0.0 }
 0x2d1   : > { %v1766_v17 = vmax.f32 %v1734_v13, 0.0 }
 0x2d2   : > { %v1796_v11 = vpack.c.bf16 %v1768_v42, %v1767_v5  ;;  %v4746_v22 = vpop.f32.mrb[40].mxu0 }
 0x2d3   : > { %v1795_v23 = vpack.c.bf16 %v1766_v17, %v1765_v16  ;;  %v1636_v24 = vadd.f32 %v4659_v27, %v4746_v22  ;;  %v4750_v20 = vpop.f32.mrb[41].mxu0 }
 0x2d4   : > { %v1628_v54 = vadd.f32 %v4661_v21, %v4750_v20  ;;  %v4754_v38 = vpop.f32.mrb[42].mxu0 }
 0x2d5   : > { %v1739_v53 = vadd.f32 %v4712_v44, %v1636_v24  ;;  %v1639_v55 = vadd.f32 %v4663_v18, %v4754_v38  ;;  %v4759_v7 = vpop.f32.mrb[43].mxu0  ;;  %3560 = vmatprep.mubr.msk.bf16.mxu0 %vm1848_vm2, %v1795_v23 }
 0x2d6   : > { %v1737_v40 = vadd.f32 %v4712_v44, %v1628_v54  ;;  %v1631_v27 = vadd.f32 %v4665_v19, %v4759_v7  ;;  %3561 = vmatmul.mubr.msk.bf16.gmra.mrb[68].mxu0 %vm1848_vm2, %v1796_v11 }
 0x2d7   : > { %v1740_v21 = vadd.f32 %v4712_v44, %v1639_v55  ;;  %v1771_v47 = vmax.f32 %v1739_v53, 0.0 }
 0x2d8   : > { %v1738_v52 = vadd.f32 %v4712_v44, %v1631_v27  ;;  %v1769_v57 = vmax.f32 %v1737_v40, 0.0 }
 0x2d9   : > { %v1772_v58 = vmax.f32 %v1740_v21, 0.0 }
 0x2da   : > { %v1770_v61 = vmax.f32 %v1738_v52, 0.0 }
 0x2db   : > { %v1798_v18 = vpack.c.bf16 %v1772_v58, %v1771_v47  ;;  %v4768_v46 = vpop.f32.mrb[44].mxu0 }
 0x2dc   : > { %v1797_v9 = vpack.c.bf16 %v1770_v61, %v1769_v57  ;;  %v1652_v26 = vadd.f32 %v4667_v28, %v4768_v46  ;;  %v4772_v48 = vpop.f32.mrb[45].mxu0 }
 0x2dd   : > { %v1644_v19 = vadd.f32 %v4669_v29, %v4772_v48  ;;  %v4776_v63 = vpop.f32.mrb[46].mxu0 }
 0x2de   : > { %v1743_v4 = vadd.f32 %v4712_v44, %v1652_v26  ;;  %v1655_v14 = vadd.f32 %v4671_v30, %v4776_v63  ;;  %v4781_v15 = vpop.f32.mrb[47].mxu0  ;;  %3564 = vmatprep.mubr.msk.bf16.mxu0 %vm1848_vm2, %v1797_v9 }
 0x2df   : > { %v1741_v10 = vadd.f32 %v4712_v44, %v1644_v19  ;;  %v1647_v28 = vadd.f32 %v4673_v31, %v4781_v15  ;;  %3565 = vmatmul.mubr.msk.bf16.gmra.mrb[72].mxu0 %vm1848_vm2, %v1798_v18 }
 0x2e0   : > { %v1744_v29 = vadd.f32 %v4712_v44, %v1655_v14  ;;  %v1775_v13 = vmax.f32 %v1743_v4, 0.0 }
 0x2e1   : > { %v1742_v12 = vadd.f32 %v4712_v44, %v1647_v28  ;;  %v1773_v42 = vmax.f32 %v1741_v10, 0.0 }
 0x2e2   : > { %v1776_v5 = vmax.f32 %v1744_v29, 0.0 }
 0x2e3   : > { %v1774_v16 = vmax.f32 %v1742_v12, 0.0 }
 0x2e4   : > { %v1800_v30 = vpack.c.bf16 %v1776_v5, %v1775_v13 }
 0x2e5   : > { %v1799_v17 = vpack.c.bf16 %v1774_v16, %v1773_v42  ;;  %v4790_v11 = vpop.f32.mrb[48].mxu0 }
 0x2e6   : > { %v1668_v23 = vadd.f32 %v4675_v32, %v4790_v11  ;;  %v4794_v24 = vpop.f32.mrb[49].mxu0 }
 0x2e7   : > { %v1660_v31 = vadd.f32 %v4677_v2, %v4794_v24  ;;  %v4798_v54 = vpop.f32.mrb[50].mxu0  ;;  %3568 = vmatprep.mubr.msk.bf16.mxu0 %vm1848_vm2, %v1799_v17 }
 0x2e8   : > { %v1747_v53 = vadd.f32 %v4712_v44, %v1668_v23  ;;  %v1671_v55 = vadd.f32 %v4679_v33, %v4798_v54  ;;  %v4804_v40 = vpop.f32.mrb[51].mxu0  ;;  %3569 = vmatmul.mubr.msk.bf16.gmra.mrb[76].mxu0 %vm1848_vm2, %v1800_v30 }
 0x2e9   : > { %v1745_v32 = vadd.f32 %v4712_v44, %v1660_v31  ;;  %v1663_v27 = vadd.f32 %v4681_v3, %v4804_v40 }
 0x2ea   : > { %v1748_v2 = vadd.f32 %v4712_v44, %v1671_v55  ;;  %v1779_v52 = vmax.f32 %v1747_v53, 0.0 }
 0x2eb   : > { %v1746_v21 = vadd.f32 %v4712_v44, %v1663_v27  ;;  %v1777_v58 = vmax.f32 %v1745_v32, 0.0 }
 0x2ec   : > { %v1780_v47 = vmax.f32 %v1748_v2, 0.0 }
 0x2ed   : > { %v1778_v57 = vmax.f32 %v1746_v21, 0.0 }
 0x2ee   : > { %v1802_v61 = vpack.c.bf16 %v1780_v47, %v1779_v52 }
 0x2ef   : > { %v1801_v18 = vpack.c.bf16 %v1778_v57, %v1777_v58 }
 0x2f0   : > { %v4812_v33 = vpop.f32.mrb[52].mxu0 }
 0x2f1   : > { %v1684_v9 = vadd.f32 %v4683_v0, %v4812_v33  ;;  %v4816_v26 = vpop.f32.mrb[53].mxu0  ;;  %3572 = vmatprep.mubr.msk.bf16.mxu0 %vm1848_vm2, %v1801_v18 }
 0x2f2   : > { %v1676_v3 = vadd.f32 %v4685_v1, %v4816_v26  ;;  %v4821_v19 = vpop.f32.mrb[54].mxu0  ;;  %3573 = vmatmul.mubr.msk.bf16.gmra.mrb[80].mxu0 %vm1848_vm2, %v1802_v61 }
 0x2f3   : > { %v1751_v4 = vadd.f32 %v4712_v44, %v1684_v9  ;;  %v1687_v14 = vadd.f32 %v4687_v34, %v4821_v19  ;;  %v4827_v10 = vpop.f32.mrb[55].mxu0 }
 0x2f4   : > { %v1749_v0 = vadd.f32 %v4712_v44, %v1676_v3  ;;  %v1679_v28 = vadd.f32 %v4689_v49, %v4827_v10 }
 0x2f5   : > { %v1752_v29 = vadd.f32 %v4712_v44, %v1687_v14  ;;  %v1783_v12 = vmax.f32 %v1751_v4, 0.0 }
 0x2f6   : > { %v1750_v1 = vadd.f32 %v4712_v44, %v1679_v28  ;;  %v1781_v5 = vmax.f32 %v1749_v0, 0.0 }
 0x2f7   : > { %v1784_v13 = vmax.f32 %v1752_v29, 0.0 }
 0x2f8   : > { %v1782_v42 = vmax.f32 %v1750_v1, 0.0  ;;  %v4834_v16 = vpop.f32.mrb[56].mxu0 }
 0x2f9   : > { %v1804_v30 = vpack.c.bf16 %v1784_v13, %v1783_v12  ;;  %v1700_v34 = vadd.f32 %v4691_v35, %v4834_v16  ;;  %v4838_v17 = vpop.f32.mrb[57].mxu0 }
 0x2fa   : > { %v1803_v23 = vpack.c.bf16 %v1782_v42, %v1781_v5  ;;  %v1692_v49 = vadd.f32 %v4693_v36, %v4838_v17  ;;  %v4842_v31 = vpop.f32.mrb[58].mxu0 }
 0x2fb   : > { %v1755_v53 = vadd.f32 %v4712_v44, %v1700_v34  ;;  %v1703_v55 = vadd.f32 %v4695_v41, %v4842_v31  ;;  %v4847_v32 = vpop.f32.mrb[59].mxu0 }
 0x2fc   : > { %v1753_v27 = vadd.f32 %v4712_v44, %v1692_v49  ;;  %v1695_v35 = vadd.f32 %v4697_v51, %v4847_v32  ;;  %3576 = vmatprep.mubr.msk.bf16.mxu0 %vm1848_vm2, %v1803_v23 }
 0x2fd   : > { %v1756_v2 = vadd.f32 %v4712_v44, %v1703_v55  ;;  %3577 = vmatmul.mubr.msk.bf16.gmra.mrb[84].mxu0 %vm1848_vm2, %v1804_v30  ;;  %v1787_v21 = vmax.f32 %v1755_v53, 0.0 }
 0x2fe   : > { %v1754_v36 = vadd.f32 %v4712_v44, %v1695_v35  ;;  %v1785_v47 = vmax.f32 %v1753_v27, 0.0 }
 0x2ff   : > { %v1788_v52 = vmax.f32 %v1756_v2, 0.0 }
 0x300   : > { %v1786_v58 = vmax.f32 %v1754_v36, 0.0  ;;  %v4856_v41 = vpop.f32.mrb[60].mxu0 }
 0x301   : > { %v1806_v57 = vpack.c.bf16 %v1788_v52, %v1787_v21  ;;  %v1716_v61 = vadd.f32 %v4699_v37, %v4856_v41  ;;  %v4860_v18 = vpop.f32.mrb[61].mxu0 }
 0x302   : > { %v1805_v51 = vpack.c.bf16 %v1786_v58, %v1785_v47  ;;  %v1708_v9 = vadd.f32 %v4701_v45, %v4860_v18  ;;  %v4864_v3 = vpop.f32.mrb[62].mxu0 }
 0x303   : > { %v1759_v4 = vadd.f32 %v4712_v44, %v1716_v61  ;;  %v1719_v14 = vadd.f32 %v4703_v39, %v4864_v3  ;;  %v4869_v0 = vpop.f32.mrb[63].mxu0 }
 0x304   : > { %v1757_v28 = vadd.f32 %v4712_v44, %v1708_v9  ;;  %v1711_v37 = vadd.f32 %v4705_v56, %v4869_v0  ;;  %3580 = vmatprep.mubr.msk.bf16.mxu0 %vm1848_vm2, %v1805_v51  ;;  %v4883_v56 = vld [vmem:[%s5305_s7 + $0x3] ss:$0 sm:$0xff] }
 0x305   : > { %v1760_v29 = vadd.f32 %v4712_v44, %v1719_v14  ;;  %3581 = vmatmul.mubr.msk.bf16.gmra.mrb[88].mxu0 %vm1848_vm2, %v1806_v57  ;;  %v1791_v1 = vmax.f32 %v1759_v4, 0.0 }
 0x306   : > { %v1758_v45 = vadd.f32 %v4712_v44, %v1711_v37  ;;  %v1789_v13 = vmax.f32 %v1757_v28, 0.0 }
 0x307   : > { %v1792_v12 = vmax.f32 %v1760_v29, 0.0 }
 0x308   : > { %v1790_v5 = vmax.f32 %v1758_v45, 0.0 }
 0x309   : > { %v1808_v39 = vpack.c.bf16 %v1792_v12, %v1791_v1 }
 0x30a   : > { %v1807_v42 = vpack.c.bf16 %v1790_v5, %v1789_v13 }
 0x30c   : > { %3584 = vmatprep.mubr.msk.bf16.mxu0 %vm1848_vm2, %v1807_v42 }
 0x30d   : > { %3585 = vmatmul.mubr.msk.bf16.gmra.mrb[92].mxu0 %vm1848_vm2, %v1808_v39 }
 0x3a1   : > { %v3558_v30 = vpop.f32.mrb[64].mxu0 }
 0x3a2   : > { %v1940_v34 = vadd.f32 %v3558_v30, %v4883_v56  ;;  %v1931_v23 = vpop.f32.mrb[65].mxu0 }
 0x3a3   : > { %v1932_v44 = vadd.f32 %v4883_v56, %v1931_v23  ;;  %v3559_v49 = vpop.f32.mrb[66].mxu0 }
 0x3a4   : > { %v2060_v53 = vsub.f32 0.0, %v1940_v34  ;;  %v1943_v55 = vadd.f32 %v3559_v49, %v4883_v56  ;;  %v1934_v27 = vpop.f32.mrb[67].mxu0 }
 0x3a5   : > { %v2058_v35 = vsub.f32 0.0, %v1932_v44  ;;  %v1935_v2 = vadd.f32 %v4883_v56, %v1934_v27 }
 0x3a6   : > { %v2094_v36 = vmul.f32 1.442695, %v2060_v53  ;;  %v2061_v21 = vsub.f32 0.0, %v1943_v55 }
 0x3a7   : > { %v2090_v52 = vmul.f32 1.442695, %v2058_v35  ;;  %v2059_v47 = vsub.f32 0.0, %v1935_v2 }
 0x3a8   : > { %3781 = vpow2.f32 %v2094_v36  ;;  %v2096_v58 = vmul.f32 1.442695, %v2061_v21 }
 0x3a9   : > { %3783 = vpow2.f32 %v2090_v52  ;;  %v2092_v57 = vmul.f32 1.442695, %v2059_v47  ;;  %v3562_v61 = vpop.f32.mrb[68].mxu0 }
 0x3aa   : > { %3785 = vpow2.f32 %v2096_v58  ;;  %v1956_v51 = vadd.f32 %v3562_v61, %v4883_v56  ;;  %v1947_v9 = vpop.f32.mrb[69].mxu0 }
 0x3ab   : > { %3787 = vpow2.f32 %v2092_v57  ;;  %v1948_v4 = vadd.f32 %v4883_v56, %v1947_v9  ;;  %v3563_v14 = vpop.f32.mrb[70].mxu0 }
 0x3ac   : > { %v2064_v28 = vsub.f32 0.0, %v1956_v51  ;;  %v1959_v37 = vadd.f32 %v3563_v14, %v4883_v56  ;;  %v1950_v29 = vpop.f32.mrb[71].mxu0 }
 0x3ad   : > { %v2062_v45 = vsub.f32 0.0, %v1948_v4  ;;  %v1951_v1 = vadd.f32 %v4883_v56, %v1950_v29 }
 0x3ae   : > { %v2102_v12 = vmul.f32 1.442695, %v2064_v28  ;;  %v2065_v13 = vsub.f32 0.0, %v1959_v37 }
 0x3af   : > { %v2098_v5 = vmul.f32 1.442695, %v2062_v45  ;;  %v2063_v39 = vsub.f32 0.0, %v1951_v1 }
 0x3b0   : > { %3789 = vpow2.f32 %v2102_v12  ;;  %v2104_v42 = vmul.f32 1.442695, %v2065_v13 }
 0x3b1   : > { %3791 = vpow2.f32 %v2098_v5  ;;  %v2100_v30 = vmul.f32 1.442695, %v2063_v39 }
 0x3b2   : > { %v3782_v34 = vpop.eup %3781  ;;  %3793 = vpow2.f32 %v2104_v42  ;;  %v3566_v23 = vpop.f32.mrb[72].mxu0 }
 0x3b3   : > { %v3784_v44 = vpop.eup %3783  ;;  %v2156_v49 = vadd.f32 1.0, %v3782_v34  ;;  %3795 = vpow2.f32 %v2100_v30  ;;  %v1972_v53 = vadd.f32 %v3566_v23, %v4883_v56  ;;  %v1963_v55 = vpop.f32.mrb[73].mxu0 }
 0x3b4   : > { %v3786_v27 = vpop.eup %3785  ;;  %v2154_v35 = vadd.f32 1.0, %v3784_v44  ;;  %v1964_v2 = vadd.f32 %v4883_v56, %v1963_v55  ;;  %v3567_v36 = vpop.f32.mrb[74].mxu0 }
 0x3b5   : > { %v3788_v21 = vpop.eup %3787  ;;  %3797 = vrcp.f32 %v2156_v49  ;;  %v2157_v52 = vadd.f32 1.0, %v3786_v27  ;;  %v2068_v47 = vsub.f32 0.0, %v1972_v53  ;;  %v1975_v58 = vadd.f32 %v3567_v36, %v4883_v56  ;;  %v1966_v57 = vpop.f32.mrb[75].mxu0 }
 0x3b6   : > { %3799 = vrcp.f32 %v2154_v35  ;;  %v2155_v61 = vadd.f32 1.0, %v3788_v21  ;;  %v2066_v51 = vsub.f32 0.0, %v1964_v2  ;;  %v1967_v9 = vadd.f32 %v4883_v56, %v1966_v57 }
 0x3b7   : > { %3801 = vrcp.f32 %v2157_v52  ;;  %v2110_v4 = vmul.f32 1.442695, %v2068_v47  ;;  %v2069_v14 = vsub.f32 0.0, %v1975_v58 }
 0x3b8   : > { %3803 = vrcp.f32 %v2155_v61  ;;  %v2106_v28 = vmul.f32 1.442695, %v2066_v51  ;;  %v2067_v37 = vsub.f32 0.0, %v1967_v9 }
 0x3b9   : > { %3805 = vpow2.f32 %v2110_v4  ;;  %v2112_v29 = vmul.f32 1.442695, %v2069_v14 }
 0x3ba   : > { %v3790_v45 = vpop.eup %3789  ;;  %3807 = vpow2.f32 %v2106_v28  ;;  %v2108_v1 = vmul.f32 1.442695, %v2067_v37 }
 0x3bb   : > { %v3792_v12 = vpop.eup %3791  ;;  %v2160_v13 = vadd.f32 1.0, %v3790_v45  ;;  %3809 = vpow2.f32 %v2112_v29  ;;  %v3570_v5 = vpop.f32.mrb[76].mxu0 }
 0x3bc   : > { %v3794_v39 = vpop.eup %3793  ;;  %v2158_v42 = vadd.f32 1.0, %v3792_v12  ;;  %3811 = vpow2.f32 %v2108_v1  ;;  %v1988_v30 = vadd.f32 %v3570_v5, %v4883_v56  ;;  %v1979_v34 = vpop.f32.mrb[77].mxu0 }
 0x3bd   : > { %v3796_v23 = vpop.eup %3795  ;;  %v2161_v44 = vadd.f32 1.0, %v3794_v39  ;;  %v1980_v49 = vadd.f32 %v4883_v56, %v1979_v34  ;;  %v3571_v53 = vpop.f32.mrb[78].mxu0 }
 0x3be   : > { %3813 = vrcp.f32 %v2158_v42  ;;  %v2159_v55 = vadd.f32 1.0, %v3796_v23  ;;  %v2072_v27 = vsub.f32 0.0, %v1988_v30  ;;  %v1991_v35 = vadd.f32 %v3571_v53, %v4883_v56  ;;  %v1982_v2 = vpop.f32.mrb[79].mxu0 }
 0x3bf   : > { %v3798_v36 = vpop.eup %3797  ;;  %3815 = vrcp.f32 %v2160_v13  ;;  %v2070_v21 = vsub.f32 0.0, %v1980_v49  ;;  %v1983_v52 = vadd.f32 %v4883_v56, %v1982_v2 }
 0x3c0   : > { %v3800_v47 = vpop.eup %3799  ;;  %3817 = vrcp.f32 %v2159_v55  ;;  %v2118_v58 = vmul.f32 1.442695, %v2072_v27  ;;  %v2073_v57 = vsub.f32 0.0, %v1991_v35  ;;  %v2220_v42 = vmul.f32 2.0, %v3798_v36 }
 0x3c1   : > { %v3802_v61 = vpop.eup %3801  ;;  %3819 = vrcp.f32 %v2161_v44  ;;  %v2114_v51 = vmul.f32 1.442695, %v2070_v21  ;;  %v2071_v9 = vsub.f32 0.0, %v1983_v52  ;;  %v2218_v4 = vmul.f32 2.0, %v3800_v47 }
 0x3c2   : > { %v3804_v14 = vpop.eup %3803  ;;  %3821 = vpow2.f32 %v2118_v58  ;;  %v2120_v28 = vmul.f32 1.442695, %v2073_v57  ;;  %v2221_v44 = vmul.f32 2.0, %v3802_v61 }
 0x3c3   : > { %v3806_v37 = vpop.eup %3805  ;;  %3823 = vpow2.f32 %v2114_v51  ;;  %v2116_v29 = vmul.f32 1.442695, %v2071_v9  ;;  %2355 = vrot.lane.b32.xlu1 %v2218_v4, %s4047_s13  ;;  %v2219_v45 = vmul.f32 2.0, %v3804_v14 }
 0x3c4   : > { %v3808_v1 = vpop.eup %3807  ;;  %v2164_v12 = vadd.f32 1.0, %v3806_v37  ;;  %3825 = vpow2.f32 %v2120_v28 }
 0x3c5   : > { %v3810_v13 = vpop.eup %3809  ;;  %v2162_v5 = vadd.f32 1.0, %v3808_v1  ;;  %3827 = vpow2.f32 %v2116_v29  ;;  %v3574_v39 = vpop.f32.mrb[80].mxu0  ;;  %2357 = vrot.lane.b32.xlu0 %v2219_v45, %s4047_s13 }
 0x3c6   : > { %v3812_v30 = vpop.eup %3811  ;;  %v2004_v34 = vadd.f32 %v3574_v39, %v4883_v56  ;;  %v1995_v23 = vpop.f32.mrb[81].mxu0  ;;  %v2165_v49 = vadd.f32 1.0, %v3810_v13 }
 0x3c7   : > { %3829 = vrcp.f32 %v2162_v5  ;;  %v2163_v53 = vadd.f32 1.0, %v3812_v30  ;;  %v1996_v55 = vadd.f32 %v4883_v56, %v1995_v23  ;;  %v3575_v27 = vpop.f32.mrb[82].mxu0  ;;  %2359 = vrot.lane.b32.xlu1 %v2220_v42, %s4047_s13 }
 0x3c8   : > { %v3814_v35 = vpop.eup %3813  ;;  %3831 = vrcp.f32 %v2164_v12  ;;  %v2076_v2 = vsub.f32 0.0, %v2004_v34  ;;  %v2007_v21 = vadd.f32 %v3575_v27, %v4883_v56  ;;  %v1998_v52 = vpop.f32.mrb[83].mxu0 }
 0x3c9   : > { %v3816_v36 = vpop.eup %3815  ;;  %3833 = vrcp.f32 %v2163_v53  ;;  %v2074_v47 = vsub.f32 0.0, %v1996_v55  ;;  %v1999_v58 = vadd.f32 %v4883_v56, %v1998_v52  ;;  %2361 = vrot.lane.b32.xlu0 %v2221_v44, %s4047_s13  ;;  %v2222_v57 = vmul.f32 2.0, %v3814_v35 }
 0x3ca   : > { %v3818_v61 = vpop.eup %3817  ;;  %v2126_v51 = vmul.f32 1.442695, %v2076_v2  ;;  %v2077_v9 = vsub.f32 0.0, %v2007_v21  ;;  %3835 = vrcp.f32 %v2165_v49  ;;  %v2224_v13 = vmul.f32 2.0, %v3816_v36 }
 0x3cb   : > { %v3820_v4 = vpop.eup %3819  ;;  %v2122_v14 = vmul.f32 1.442695, %v2074_v47  ;;  %v2075_v28 = vsub.f32 0.0, %v1999_v58  ;;  %2363 = vrot.lane.b32.xlu1 %v2222_v57, %s4047_s13  ;;  %v2223_v37 = vmul.f32 2.0, %v3818_v61 }
 0x3cc   : > { %v3822_v29 = vpop.eup %3821  ;;  %3837 = vpow2.f32 %v2126_v51  ;;  %v2128_v45 = vmul.f32 1.442695, %v2077_v9  ;;  %v2225_v34 = vmul.f32 2.0, %v3820_v4 }
 0x3cd   : > { %v3824_v1 = vpop.eup %3823  ;;  %v2168_v12 = vadd.f32 1.0, %v3822_v29  ;;  %3839 = vpow2.f32 %v2122_v14  ;;  %2365 = vrot.lane.b32.xlu0 %v2223_v37, %s4047_s13  ;;  %v2124_v30 = vmul.f32 1.442695, %v2075_v28 }
 0x3ce   : > { %v3826_v5 = vpop.eup %3825  ;;  %v2166_v39 = vadd.f32 1.0, %v3824_v1  ;;  %3841 = vpow2.f32 %v2128_v45 }
 0x3cf   : > { %v3828_v42 = vpop.eup %3827  ;;  %2367 = vrot.lane.b32.xlu1 %v2224_v13, %s4047_s13  ;;  %v2169_v23 = vadd.f32 1.0, %v3826_v5 }
 0x3d0   : > { %3843 = vrcp.f32 %v2166_v39  ;;  %v2167_v44 = vadd.f32 1.0, %v3828_v42  ;;  %v3578_v49 = vpop.f32.mrb[84].mxu0 }
 0x3d1   : > { %v3830_v53 = vpop.eup %3829  ;;  %3845 = vrcp.f32 %v2168_v12  ;;  %v2020_v55 = vadd.f32 %v3578_v49, %v4883_v56  ;;  %v2011_v27 = vpop.f32.mrb[85].mxu0  ;;  %2369 = vrot.lane.b32.xlu0 %v2225_v34, %s4047_s13 }
 0x3d2   : > { %v3832_v35 = vpop.eup %3831  ;;  %3847 = vrcp.f32 %v2167_v44  ;;  %v2012_v2 = vadd.f32 %v4883_v56, %v2011_v27  ;;  %v3579_v21 = vpop.f32.mrb[86].mxu0  ;;  %v2226_v52 = vmul.f32 2.0, %v3830_v53 }
 0x3d3   : > { %v3834_v36 = vpop.eup %3833  ;;  %3849 = vpow2.f32 %v2124_v30  ;;  %v2080_v47 = vsub.f32 0.0, %v2020_v55  ;;  %v2023_v58 = vadd.f32 %v3579_v21, %v4883_v56  ;;  %v2014_v57 = vpop.f32.mrb[87].mxu0  ;;  %v2228_v1 = vmul.f32 2.0, %v3832_v35 }
 0x3d4   : > { %3851 = vrcp.f32 %v2169_v23  ;;  %v2078_v61 = vsub.f32 0.0, %v2012_v2  ;;  %v2015_v51 = vadd.f32 %v4883_v56, %v2014_v57  ;;  %2371 = vrot.lane.b32.xlu1 %v2226_v52, %s4047_s13  ;;  %v2227_v9 = vmul.f32 2.0, %v3834_v36  ;;  %v3836_v4 = vpop.eup %3835 }
 0x3d5   : > { %v2134_v14 = vmul.f32 1.442695, %v2080_v47  ;;  %v2081_v28 = vsub.f32 0.0, %v2023_v58  ;;  %v2229_v34 = vmul.f32 2.0, %v3836_v4 }
 0x3d6   : > { %v3838_v37 = vpop.eup %3837  ;;  %v2130_v29 = vmul.f32 1.442695, %v2078_v61  ;;  %v2079_v45 = vsub.f32 0.0, %v2015_v51  ;;  %2373 = vrot.lane.b32.xlu0 %v2227_v9, %s4047_s13 }
 0x3d7   : > { %v3840_v12 = vpop.eup %3839  ;;  %v2172_v13 = vadd.f32 1.0, %v3838_v37  ;;  %3853 = vpow2.f32 %v2134_v14  ;;  %v2136_v42 = vmul.f32 1.442695, %v2081_v28 }
 0x3d8   : > { %v3842_v5 = vpop.eup %3841  ;;  %v2170_v39 = vadd.f32 1.0, %v3840_v12  ;;  %3855 = vpow2.f32 %v2130_v29  ;;  %v3582_v30 = vpop.f32.mrb[88].mxu0  ;;  %2375 = vrot.lane.b32.xlu1 %v2228_v1, %s4047_s13  ;;  %v2132_v23 = vmul.f32 1.442695, %v2079_v45 }
 0x3d9   : > { %v2036_v44 = vadd.f32 %v3582_v30, %v4883_v56  ;;  %v2027_v49 = vpop.f32.mrb[89].mxu0  ;;  %v2173_v55 = vadd.f32 1.0, %v3842_v5 }
 0x3da   : > { %v3844_v53 = vpop.eup %3843  ;;  %3857 = vrcp.f32 %v2170_v39  ;;  %v2028_v27 = vadd.f32 %v4883_v56, %v2027_v49  ;;  %v3583_v35 = vpop.f32.mrb[90].mxu0  ;;  %2377 = vrot.lane.b32.xlu0 %v2229_v34, %s4047_s13 }
 0x3db   : > { %v3846_v2 = vpop.eup %3845  ;;  %3859 = vrcp.f32 %v2172_v13  ;;  %v2084_v21 = vsub.f32 0.0, %v2036_v44  ;;  %v2039_v52 = vadd.f32 %v3583_v35, %v4883_v56  ;;  %v2030_v36 = vpop.f32.mrb[91].mxu0  ;;  %v2230_v47 = vmul.f32 2.0, %v3844_v53 }
 0x3dc   : > { %v3848_v58 = vpop.eup %3847  ;;  %3861 = vpow2.f32 %v2136_v42  ;;  %v2082_v57 = vsub.f32 0.0, %v2028_v27  ;;  %v2031_v61 = vadd.f32 %v4883_v56, %v2030_v36  ;;  %v2232_v12 = vmul.f32 2.0, %v3846_v2 }
 0x3dd   : > { %v3850_v51 = vpop.eup %3849  ;;  %3863 = vpow2.f32 %v2132_v23  ;;  %v2142_v9 = vmul.f32 1.442695, %v2084_v21  ;;  %v2085_v4 = vsub.f32 0.0, %v2039_v52  ;;  %2379 = vrot.lane.b32.xlu1 %v2230_v47, %s4047_s13  ;;  %v2231_v14 = vmul.f32 2.0, %v3848_v58 }
 0x3de   : > { %v3852_v28 = vpop.eup %3851  ;;  %3865 = vrcp.f32 %v2173_v55  ;;  %v2171_v37 = vadd.f32 1.0, %v3850_v51  ;;  %v2138_v29 = vmul.f32 1.442695, %v2082_v57  ;;  %v2083_v45 = vsub.f32 0.0, %v2031_v61 }
 0x3df   : > { %3867 = vpow2.f32 %v2142_v9  ;;  %v2144_v1 = vmul.f32 1.442695, %v2085_v4  ;;  %2381 = vrot.lane.b32.xlu0 %v2231_v14, %s4047_s13  ;;  %v2233_v34 = vmul.f32 2.0, %v3852_v28 }
 0x3e0   : > { %3869 = vrcp.f32 %v2171_v37  ;;  %v2140_v13 = vmul.f32 1.442695, %v2083_v45  ;;  %v3586_v5 = vpop.f32.mrb[92].mxu0 }
 0x3e1   : > { %v3854_v39 = vpop.eup %3853  ;;  %3871 = vpow2.f32 %v2138_v29  ;;  %v2052_v42 = vadd.f32 %v3586_v5, %v4883_v56  ;;  %v2043_v30 = vpop.f32.mrb[93].mxu0  ;;  %2383 = vrot.lane.b32.xlu1 %v2232_v12, %s4047_s13 }
 0x3e2   : > { %v3856_v23 = vpop.eup %3855  ;;  %v2176_v44 = vadd.f32 1.0, %v3854_v39  ;;  %3873 = vpow2.f32 %v2144_v1  ;;  %v2044_v49 = vadd.f32 %v4883_v56, %v2043_v30  ;;  %v3587_v53 = vpop.f32.mrb[94].mxu0 }
 0x3e3   : > { %v2174_v55 = vadd.f32 1.0, %v3856_v23  ;;  %3875 = vpow2.f32 %v2140_v13  ;;  %v2088_v27 = vsub.f32 0.0, %v2052_v42  ;;  %v2055_v35 = vadd.f32 %v3587_v53, %v4883_v56  ;;  %v2046_v2 = vpop.f32.mrb[95].mxu0  ;;  %2385 = vrot.lane.b32.xlu0 %v2233_v34, %s4047_s13 }
 0x3e4   : > { %v3858_v21 = vpop.eup %3857  ;;  %v2086_v52 = vsub.f32 0.0, %v2044_v49  ;;  %v2047_v36 = vadd.f32 %v4883_v56, %v2046_v2 }
 0x3e5   : > { %v3860_v47 = vpop.eup %3859  ;;  %3877 = vrcp.f32 %v2174_v55  ;;  %v2150_v58 = vmul.f32 1.442695, %v2088_v27  ;;  %v2089_v57 = vsub.f32 0.0, %v2055_v35  ;;  %v2234_v61 = vmul.f32 2.0, %v3858_v21 }
 0x3e6   : > { %v3862_v51 = vpop.eup %3861  ;;  %3879 = vrcp.f32 %v2176_v44  ;;  %v2146_v9 = vmul.f32 1.442695, %v2086_v52  ;;  %v2087_v4 = vsub.f32 0.0, %v2047_v36  ;;  %v2236_v12 = vmul.f32 2.0, %v3860_v47 }
 0x3e7   : > { %v3864_v14 = vpop.eup %3863  ;;  %3881 = vpow2.f32 %v2150_v58  ;;  %v2152_v28 = vmul.f32 1.442695, %v2089_v57  ;;  %2387 = vrot.lane.b32.xlu1 %v2234_v61, %s4047_s13  ;;  %v2177_v29 = vadd.f32 1.0, %v3862_v51 }
 0x3e8   : > { %v3866_v37 = vpop.eup %3865  ;;  %v2175_v45 = vadd.f32 1.0, %v3864_v14  ;;  %3883 = vpow2.f32 %v2146_v9  ;;  %v2148_v56 = vmul.f32 1.442695, %v2087_v4 }
 0x3e9   : > { %v3868_v1 = vpop.eup %3867  ;;  %v2237_v53 = vmul.f32 2.0, %v3866_v37 }
 0x3ea   : > { %v3870_v13 = vpop.eup %3869  ;;  %3885 = vrcp.f32 %v2175_v45  ;;  %v2180_v39 = vadd.f32 1.0, %v3868_v1 }
 0x3eb   : > { %v3872_v5 = vpop.eup %3871  ;;  %3887 = vpow2.f32 %v2152_v28  ;;  %v2235_v42 = vmul.f32 2.0, %v3870_v13  ;;  %2391 = vrot.lane.b32.xlu1 %v2236_v12, %s4047_s13  ;;  %v3649_v12 = vld [vmem:[%s5304_s6] sm:$0xff]  }
 0x3ec   : > { %v3874_v30 = vpop.eup %3873  ;;  %3889 = vrcp.f32 %v2177_v29  ;;  %v2178_v34 = vadd.f32 1.0, %v3872_v5  ;;  %3588 = vmatprep.subr.bf16.mxu1 %v3649_v12 }
 0x3ed   : > { %v3876_v23 = vpop.eup %3875  ;;  %3891 = vpow2.f32 %v2148_v56  ;;  %2389 = vrot.lane.b32.xlu0 %v2235_v42, %s4047_s13  ;;  %v2181_v27 = vadd.f32 1.0, %v3874_v30  ;;  %3589 = vmatpush3.bf16.msra.mxu1 %v3649_v12 }
 0x3ee   : > { %3893 = vrcp.f32 %v2178_v34  ;;  %v2179_v44 = vadd.f32 1.0, %v3876_v23  ;;  %v3650_v23 = vld [vmem:[%s5304_s6 + $0x8] sm:$0xff]  }
 0x3ef   : > { %v3878_v49 = vpop.eup %3877  ;;  %3895 = vrcp.f32 %v2180_v39  ;;  %3590 = vmatprep.subr.bf16.mxu1 %v3650_v23 }
 0x3f0   : > { %v3880_v55 = vpop.eup %3879  ;;  %3897 = vrcp.f32 %v2179_v44  ;;  %v2238_v35 = vmul.f32 2.0, %v3878_v49  ;;  %v3651_v44 = vld [vmem:[%s5304_s6 + $0x10] sm:$0xff]  }
 0x3f1   : > { %v3882_v2 = vpop.eup %3881  ;;  %2393 = vrot.lane.b32.xlu0 %v2237_v53, %s4047_s13  ;;  %3899 = vrcp.f32 %v2181_v27  ;;  %v2240_v58 = vmul.f32 2.0, %v3880_v55  ;;  %3591 = vmatpush3.bf16.msra.mxu1 %v3650_v23 }
 0x3f2   : > { %v3884_v21 = vpop.eup %3883  ;;  %2395 = vrot.lane.b32.xlu1 %v2238_v35, %s4047_s13  ;;  %v2184_v47 = vadd.f32 1.0, %v3882_v2  ;;  %3592 = vmatprep.subr.bf16.mxu1 %v3651_v44  ;;  %v3652_v35 = vld [vmem:[%s5304_s6 + $0x18] sm:$0xff]  }
 0x3f3   : > { %v2182_v52 = vadd.f32 1.0, %v3884_v21  ;;  %v4961_v21 = vpop.permute.xlu0 %2256 }
 0x3f4   : > { %v3886_v36 = vpop.eup %3885 }
 0x3f5   : > { %v3888_v57 = vpop.eup %3887  ;;  %3901 = vrcp.f32 %v2182_v52  ;;  %v2239_v61 = vmul.f32 2.0, %v3886_v36  ;;  %3593 = vmatpush3.bf16.msra.mxu1 %v3651_v44  ;;  %v2259_v52 = vadd.f32 %v4961_v21, %v4715_v25  ;;  %v2260_v36 = vadd.f32 %v4961_v21, %v4722_v6 }
 0x3f6   : > { %v3890_v51 = vpop.eup %3889  ;;  %2399 = vrot.lane.b32.xlu1 %v2240_v58, %s4047_s13  ;;  %3903 = vrcp.f32 %v2184_v47  ;;  %v2185_v14 = vadd.f32 1.0, %v3888_v57  ;;  %3594 = vmatprep.subr.bf16.mxu1 %v3652_v35  ;;  %v2261_v47 = vadd.f32 %v4707_v59, %v4961_v21  ;;  %v2263_v59 = vadd.f32 %v4961_v21, %v4731_v62 }
 0x3f7   : > { %v3892_v9 = vpop.eup %3891  ;;  %2397 = vrot.lane.b32.xlu0 %v2239_v61, %s4047_s13  ;;  %v2241_v29 = vmul.f32 2.0, %v3890_v51  ;;  %v2291_v57 = vmax.f32 %v2259_v52, 0.0  ;;  %v2262_v61 = vadd.f32 %v4718_v60, %v4961_v21  ;;  %v2292_v51 = vmax.f32 %v2260_v36, 0.0 }
 0x3f8   : > { %v3894_v4 = vpop.eup %3893  ;;  %v2183_v28 = vadd.f32 1.0, %v3892_v9  ;;  %v2293_v25 = vmax.f32 %v2261_v47, 0.0  ;;  %v2266_v62 = vadd.f32 %v4734_v43, %v4961_v21  ;;  %v2268_v43 = vadd.f32 %v4961_v21, %v4759_v7 }
 0x3f9   : > { %v3896_v37 = vpop.eup %3895  ;;  %v2242_v45 = vmul.f32 2.0, %v3894_v4  ;;  %3595 = vmatpush3.bf16.msra.mxu1 %v3652_v35  ;;  %v2294_v6 = vmax.f32 %v2262_v61, 0.0  ;;  %v2269_v52 = vadd.f32 %v4746_v22, %v4961_v21  ;;  %v2271_v22 = vadd.f32 %v4961_v21, %v4772_v48 }
 0x3fa   : > { %v3898_v1 = vpop.eup %3897  ;;  %3905 = vrcp.f32 %v2183_v28  ;;  %v2244_v13 = vmul.f32 2.0, %v3896_v37  ;;  %v2264_v37 = vadd.f32 %v4961_v21, %v4738_v50  ;;  %v2300_v47 = vmax.f32 %v2268_v43, 0.0 }
 0x3fb   : > { %2401 = vrot.lane.b32.xlu0 %v2241_v29, %s4047_s13  ;;  %2403 = vrot.lane.b32.xlu1 %v2242_v45, %s4047_s13  ;;  %v2243_v56 = vmul.f32 2.0, %v3898_v1  ;;  %3907 = vrcp.f32 %v2185_v14  ;;  %v3900_v5 = vpop.eup %3899  ;;  %v2274_v48 = vadd.f32 %v4776_v63, %v4961_v21  ;;  %v2275_v43 = vadd.f32 %v4961_v21, %v4794_v24 }
 0x3fc   : > { %v2245_v30 = vmul.f32 2.0, %v3900_v5  ;;  %v2296_v5 = vmax.f32 %v2264_v37, 0.0 }
 0x3ff   : > { %v3902_v39 = vpop.eup %3901  ;;  %2405 = vrot.lane.b32.xlu0 %v2243_v56, %s4047_s13  ;;  %2407 = vrot.lane.b32.xlu1 %v2244_v13, %s4047_s13  ;;  %v2265_v56 = vadd.f32 %v4728_v8, %v4961_v21  ;;  %v2295_v13 = vmax.f32 %v2263_v59, 0.0  ;;  %v2298_v8 = vmax.f32 %v2266_v62, 0.0 }
 0x400   : > { %v2246_v42 = vmul.f32 2.0, %v3902_v39  ;;  %v3904_v34 = vpop.eup %3903 }
 0x401   : > { %v2248_v55 = vmul.f32 2.0, %v3904_v34  ;;  %v2297_v23 = vmax.f32 %v2265_v56, 0.0  ;;  %v2303_v56 = vmax.f32 %v2271_v22, 0.0 }
 0x403   : > { %2409 = vrot.lane.b32.xlu0 %v2245_v30, %s4047_s13  ;;  %2411 = vrot.lane.b32.xlu1 %v2246_v42, %s4047_s13 }
 0x404   : > { %v3906_v49 = vpop.eup %3905 }
 0x405   : > { %v2247_v53 = vmul.f32 2.0, %v3906_v49  ;;  %v3908_v27 = vpop.eup %3907  ;;  %v2267_v49 = vadd.f32 %v4961_v21, %v4750_v20  ;;  %v2270_v20 = vadd.f32 %v4754_v38, %v4961_v21  ;;  %v2272_v38 = vadd.f32 %v4961_v21, %v4781_v15 }
 0x406   : > { %v2249_v2 = vmul.f32 2.0, %v3908_v27 }
 0x407   : > { %2413 = vrot.lane.b32.xlu0 %v2247_v53, %s4047_s13  ;;  %2415 = vrot.lane.b32.xlu1 %v2248_v55, %s4047_s13  ;;  %v2299_v36 = vmax.f32 %v2267_v49, 0.0 }
 0x40b   : > { %2417 = vrot.lane.b32.xlu0 %v2249_v2, %s4047_s13 }
 0x435   : > { %v4969_v58 = vpop.permute.xlu1 %2355 }
 0x436   : > { %v2451_v4 = vmul.f32 %v4969_v58, %v2291_v57 }
 0x437   : > { %v4973_v9 = vpop.permute.xlu0 %2357 }
 0x438   : > { %v2452_v14 = vmul.f32 %v4973_v9, %v2292_v51 }
 0x439   : > { %v4977_v28 = vpop.permute.xlu1 %2359 }
 0x43a   : > { %v2483_v29 = vpack.c.bf16 %v2452_v14, %v2451_v4  ;;  %v2453_v60 = vmul.f32 %v4977_v28, %v2293_v25  ;;  %v2301_v4 = vmax.f32 %v2269_v52, 0.0  ;;  %v2302_v14 = vmax.f32 %v2270_v20, 0.0 }
 0x43b   : > { %v4983_v45 = vpop.permute.xlu0 %2361  ;;  %v2278_v52 = vadd.f32 %v4798_v54, %v4961_v21  ;;  %v2280_v54 = vadd.f32 %v4961_v21, %v4827_v10 }
 0x43c   : > { %v2454_v1 = vmul.f32 %v4983_v45, %v2294_v6  ;;  %2530 = vrot.lane.b32.xlu1 %v2483_v29, %s4047_s13 }
 0x43d   : > { %v4990_v12 = vpop.permute.xlu1 %2363 }
 0x43e   : > { %v2484_v50 = vpack.c.bf16 %v2454_v1, %v2453_v60  ;;  %v2455_v42 = vmul.f32 %v4990_v12, %v2295_v13  ;;  %v2273_v1 = vadd.f32 %v4768_v46, %v4961_v21  ;;  %v2304_v13 = vmax.f32 %v2272_v38, 0.0 }
 0x43f   : > { %v4994_v39 = vpop.permute.xlu0 %2365 }
 0x440   : > { %v2456_v30 = vmul.f32 %v4994_v39, %v2296_v5  ;;  %2532 = vrot.lane.b32.xlu0 %v2484_v50, %s4047_s13 }
 0x441   : > { %v4999_v34 = vpop.permute.xlu1 %2367 }
 0x442   : > { %v2485_v44 = vpack.c.bf16 %v2456_v30, %v2455_v42  ;;  %v2457_v55 = vmul.f32 %v4999_v34, %v2297_v23  ;;  %v2305_v42 = vmax.f32 %v2273_v1, 0.0  ;;  %v2306_v30 = vmax.f32 %v2274_v48, 0.0 }
 0x443   : > { %v5005_v53 = vpop.permute.xlu0 %2369  ;;  %v2282_v1 = vadd.f32 %v4821_v19, %v4961_v21 }
 0x444   : > { %v2458_v27 = vmul.f32 %v5005_v53, %v2298_v8  ;;  %2534 = vrot.lane.b32.xlu1 %v2485_v44, %s4047_s13 }
 0x446   : > { %v2486_v35 = vpack.c.bf16 %v2458_v27, %v2457_v55  ;;  %v5010_v2 = vpop.permute.xlu1 %2371  ;;  %v2276_v55 = vadd.f32 %v4961_v21, %v4804_v40  ;;  %v2277_v27 = vadd.f32 %v4790_v11, %v4961_v21  ;;  %v2310_v40 = vmax.f32 %v2278_v52, 0.0 }
 0x447   : > { %v2459_v57 = vmul.f32 %v5010_v2, %v2299_v36  ;;  %v2279_v11 = vadd.f32 %v4961_v21, %v4816_v26  ;;  %v2312_v26 = vmax.f32 %v2280_v54, 0.0 }
 0x448   : > { %v5016_v7 = vpop.permute.xlu0 %2373  ;;  %2536 = vrot.lane.b32.xlu0 %v2486_v35, %s4047_s13  ;;  %v2307_v35 = vmax.f32 %v2275_v43, 0.0  ;;  %v2308_v36 = vmax.f32 %v2276_v55, 0.0 }
 0x449   : > { %v2460_v61 = vmul.f32 %v5016_v7, %v2300_v47 }
 0x44a   : > { %v5021_v51 = vpop.permute.xlu1 %2375 }
 0x44b   : > { %v2487_v25 = vpack.c.bf16 %v2460_v61, %v2459_v57  ;;  %v2461_v59 = vmul.f32 %v5021_v51, %v2301_v4  ;;  %v2309_v61 = vmax.f32 %v2277_v27, 0.0 }
 0x44c   : > { %v5027_v6 = vpop.permute.xlu0 %2377 }
 0x44d   : > { %v2462_v37 = vmul.f32 %v5027_v6, %v2302_v14  ;;  %2538 = vrot.lane.b32.xlu1 %v2487_v25, %s4047_s13 }
 0x44f   : > { %v2488_v29 = vpack.c.bf16 %v2462_v37, %v2461_v59  ;;  %v5032_v60 = vpop.permute.xlu1 %2379  ;;  %v2281_v37 = vadd.f32 %v4812_v33, %v4961_v21  ;;  %v2283_v33 = vadd.f32 %v4961_v21, %v4838_v17  ;;  %v2286_v17 = vadd.f32 %v4842_v31, %v4961_v21 }
 0x450   : > { %v2463_v62 = vmul.f32 %v5032_v60, %v2303_v56  ;;  %v2288_v31 = vadd.f32 %v4961_v21, %v4869_v0 }
 0x451   : > { %v5038_v15 = vpop.permute.xlu0 %2381  ;;  %2540 = vrot.lane.b32.xlu0 %v2488_v29, %s4047_s13  ;;  %v2311_v29 = vmax.f32 %v2279_v11, 0.0  ;;  %v2315_v43 = vmax.f32 %v2283_v33, 0.0 }
 0x452   : > { %v2464_v5 = vmul.f32 %v5038_v15, %v2304_v13 }
 0x453   : > { %v5043_v50 = vpop.permute.xlu1 %2383 }
 0x454   : > { %v2489_v23 = vpack.c.bf16 %v2464_v5, %v2463_v62  ;;  %v2465_v46 = vmul.f32 %v5043_v50, %v2305_v42  ;;  %v2313_v62 = vmax.f32 %v2281_v37, 0.0  ;;  %v2314_v5 = vmax.f32 %v2282_v1, 0.0 }
 0x455   : > { %v5045_v8 = vpop.permute.xlu0 %2385  ;;  %v2284_v42 = vadd.f32 %v4961_v21, %v4847_v32 }
 0x456   : > { %v2466_v63 = vmul.f32 %v5045_v8, %v2306_v30  ;;  %2542 = vrot.lane.b32.xlu1 %v2489_v23, %s4047_s13 }
 0x457   : > { %v2316_v55 = vmax.f32 %v2284_v42, 0.0 }
 0x458   : > { %v2490_v44 = vpack.c.bf16 %v2466_v63, %v2465_v46 }
 0x459   : > { %v5050_v49 = vpop.permute.xlu1 %2387 }
 0x45a   : > { %2544 = vrot.lane.b32.xlu0 %v2490_v44, %s4047_s13  ;;  %v2467_v57 = vmul.f32 %v5050_v49, %v2307_v35  ;;  %v2285_v44 = vadd.f32 %v4834_v16, %v4961_v21  ;;  %v2287_v16 = vadd.f32 %v4961_v21, %v4860_v18  ;;  %v2290_v18 = vadd.f32 %v4864_v3, %v4961_v21 }
 0x45d   : > { %v5061_v20 = vpop.permute.xlu1 %2391 }
 0x45e   : > { %v2469_v25 = vmul.f32 %v5061_v20, %v2309_v61 }
 0x45f   : > { %v5063_v47 = vpop.permute.xlu0 %2389 }
 0x460   : > { %v2468_v24 = vmul.f32 %v5063_v47, %v2308_v36 }
 0x462   : > { %v2491_v4 = vpack.c.bf16 %v2468_v24, %v2467_v57  ;;  %v2317_v57 = vmax.f32 %v2285_v44, 0.0  ;;  %v2318_v24 = vmax.f32 %v2286_v17, 0.0 }
 0x463   : > { %v5067_v14 = vpop.permute.xlu0 %2393 }
 0x464   : > { %v2470_v22 = vmul.f32 %v5067_v14, %v2310_v40  ;;  %2546 = vrot.lane.b32.xlu1 %v2491_v4, %s4047_s13  ;;  %v5076_v38 = vpop.permute.xlu1 %2395 }
 0x465   : > { %v2471_v48 = vmul.f32 %v5076_v38, %v2311_v29 }
 0x466   : > { %v2492_v59 = vpack.c.bf16 %v2470_v22, %v2469_v25  ;;  %v2289_v25 = vadd.f32 %v4856_v41, %v4961_v21  ;;  %v2319_v22 = vmax.f32 %v2287_v16, 0.0 }
 0x468   : > { %2548 = vrot.lane.b32.xlu0 %v2492_v59, %s4047_s13  ;;  %v5083_v10 = vpop.permute.xlu1 %2399  ;;  %v2320_v59 = vmax.f32 %v2288_v31, 0.0 }
 0x469   : > { %v5085_v56 = vpop.permute.xlu0 %2397  ;;  %v2473_v46 = vmul.f32 %v5083_v10, %v2313_v62 }
 0x46a   : > { %v2472_v13 = vmul.f32 %v5085_v56, %v2312_v26 }
 0x46c   : > { %v2493_v19 = vpack.c.bf16 %v2472_v13, %v2471_v48  ;;  %v2321_v48 = vmax.f32 %v2289_v25, 0.0  ;;  %v2322_v13 = vmax.f32 %v2290_v18, 0.0 }
 0x46d   : > { %v5093_v30 = vpop.permute.xlu0 %2401  ;;  %v5095_v23 = vpop.permute.xlu1 %2403 }
 0x46e   : > { %v2474_v63 = vmul.f32 %v5093_v30, %v2314_v5  ;;  %2550 = vrot.lane.b32.xlu1 %v2493_v19, %s4047_s13  ;;  %v2475_v52 = vmul.f32 %v5095_v23, %v2315_v43 }
 0x470   : > { %v2494_v32 = vpack.c.bf16 %v2474_v63, %v2473_v46 }
 0x471   : > { %v5104_v27 = vpop.permute.xlu0 %2405  ;;  %v5106_v35 = vpop.permute.xlu1 %2407 }
 0x472   : > { %v2476_v36 = vmul.f32 %v5104_v27, %v2316_v55  ;;  %2552 = vrot.lane.b32.xlu0 %v2494_v32, %s4047_s13  ;;  %v2477_v11 = vmul.f32 %v5106_v35, %v2317_v57 }
 0x474   : > { %v2495_v61 = vpack.c.bf16 %v2476_v36, %v2475_v52 }
 0x475   : > { %v5115_v40 = vpop.permute.xlu0 %2409  ;;  %v5117_v4 = vpop.permute.xlu1 %2411 }
 0x476   : > { %v2478_v54 = vmul.f32 %v5115_v40, %v2318_v24  ;;  %2554 = vrot.lane.b32.xlu1 %v2495_v61, %s4047_s13  ;;  %v2479_v29 = vmul.f32 %v5117_v4, %v2319_v22  ;;  %v5158_v61 = vld [vmem:[%s5305_s7 + $0x5] ss:$0 sm:$0xff] }
 0x478   : > { %v2496_v0 = vpack.c.bf16 %v2478_v54, %v2477_v11 }
 0x479   : > { %v5126_v37 = vpop.permute.xlu0 %2413  ;;  %v5131_v26 = vpop.permute.xlu1 %2415 }
 0x47a   : > { %v2480_v1 = vmul.f32 %v5126_v37, %v2320_v59  ;;  %2556 = vrot.lane.b32.xlu0 %v2496_v0, %s4047_s13  ;;  %v2481_v5 = vmul.f32 %v5131_v26, %v2321_v48 }
 0x47c   : > { %v2497_v62 = vpack.c.bf16 %v2480_v1, %v2479_v29 }
 0x47d   : > { %v5133_v41 = vpop.permute.xlu0 %2417 }
 0x47e   : > { %v2482_v3 = vmul.f32 %v5133_v41, %v2322_v13  ;;  %2558 = vrot.lane.b32.xlu1 %v2497_v62, %s4047_s13 }
 0x480   : > { %v2498_v21 = vpack.c.bf16 %v2482_v3, %v2481_v5 }
 0x482   : > { %2560 = vrot.lane.b32.xlu0 %v2498_v21, %s4047_s13 }
 0x4ae   : > { %v2531_v33 = vpop.permute.xlu1 %2530 }
 0x4af   : > { %3596 = vmatprep.mubr.msk.bf16.mxu1 %vm1848_vm2, %v2531_v33 }
 0x4b2   : > { %v2533_v42 = vpop.permute.xlu0 %2532 }
 0x4b3   : > { %3597 = vmatmul.mubr.msk.bf16.vlgmr.msra.gmra.mrb[64].mxu1 %vm1848_vm2, %v2533_v42 }
 0x4b6   : > { %v2535_v19 = vpop.permute.xlu1 %2534 }
 0x4b7   : > { %3600 = vmatprep.mubr.msk.bf16.mxu1 %vm1848_vm2, %v2535_v19 }
 0x4ba   : > { %v2537_v46 = vpop.permute.xlu0 %2536 }
 0x4bb   : > { %3601 = vmatmul.mubr.msk.bf16.gmra.mrb[68].mxu1 %vm1848_vm2, %v2537_v46 }
 0x4bf   : > { %v2539_v63 = vpop.permute.xlu1 %2538 }
 0x4c0   : > { %3604 = vmatprep.mubr.msk.bf16.mxu1 %vm1848_vm2, %v2539_v63 }
 0x4c3   : > { %v2541_v44 = vpop.permute.xlu0 %2540 }
 0x4c4   : > { %3605 = vmatmul.mubr.msk.bf16.gmra.mrb[72].mxu1 %vm1848_vm2, %v2541_v44 }
 0x4c8   : > { %v2543_v43 = vpop.permute.xlu1 %2542 }
 0x4c9   : > { %3608 = vmatprep.mubr.msk.bf16.mxu1 %vm1848_vm2, %v2543_v43 }
 0x4cc   : > { %v2545_v17 = vpop.permute.xlu0 %2544 }
 0x4cd   : > { %3609 = vmatmul.mubr.msk.bf16.gmra.mrb[76].mxu1 %vm1848_vm2, %v2545_v17 }
 0x4d6   : > { %v2547_v55 = vpop.permute.xlu1 %2546 }
 0x4d7   : > { %3612 = vmatprep.mubr.msk.bf16.mxu1 %vm1848_vm2, %v2547_v55 }
 0x4da   : > { %v2549_v32 = vpop.permute.xlu0 %2548 }
 0x4db   : > { %3613 = vmatmul.mubr.msk.bf16.gmra.mrb[80].mxu1 %vm1848_vm2, %v2549_v32 }
 0x4e0   : > { %v2551_v52 = vpop.permute.xlu1 %2550 }
 0x4e1   : > { %3616 = vmatprep.mubr.msk.bf16.mxu1 %vm1848_vm2, %v2551_v52 }
 0x4e4   : > { %v2553_v36 = vpop.permute.xlu0 %2552 }
 0x4e5   : > { %3617 = vmatmul.mubr.msk.bf16.gmra.mrb[84].mxu1 %vm1848_vm2, %v2553_v36 }
 0x4e8   : > { %v2555_v57 = vpop.permute.xlu1 %2554 }
 0x4e9   : > { %3620 = vmatprep.mubr.msk.bf16.mxu1 %vm1848_vm2, %v2555_v57 }
 0x4ec   : > { %v2557_v24 = vpop.permute.xlu0 %2556 }
 0x4ed   : > { %3621 = vmatmul.mubr.msk.bf16.gmra.mrb[88].mxu1 %vm1848_vm2, %v2557_v24 }
 0x4f0   : > { %v2559_v16 = vpop.permute.xlu1 %2558 }
 0x4f1   : > { %3624 = vmatprep.mubr.msk.bf16.mxu1 %vm1848_vm2, %v2559_v16 }
 0x4f4   : > { %v2561_v31 = vpop.permute.xlu0 %2560 }
 0x4f5   : > { %3625 = vmatmul.mubr.msk.bf16.gmra.mrb[92].mxu1 %vm1848_vm2, %v2561_v31 }
 0x586   : > { %v3598_v11 = vpop.f32.mrb[64].mxu1 }
 0x587   : > { %v2677_v54 = vadd.f32 %v3598_v11, %v5158_v61  ;;  %v2668_v25 = vpop.f32.mrb[65].mxu1 }
 0x588   : > { %v2669_v22 = vadd.f32 %v5158_v61, %v2668_v25  ;;  %v3599_v18 = vpop.f32.mrb[66].mxu1 }
 0x589   : > { %v3266_v59 = vmul.f32 -1.442695, %v2677_v54  ;;  %v2680_v0 = vadd.f32 %v3599_v18, %v5158_v61  ;;  %v2671_v29 = vpop.f32.mrb[67].mxu1 }
 0x58a   : > { %v3264_v1 = vmul.f32 -1.442695, %v2669_v22  ;;  %v2672_v48 = vadd.f32 %v5158_v61, %v2671_v29 }
 0x58b   : > { %3909 = vpow2.f32 %v3266_v59  ;;  %v3267_v13 = vmul.f32 -1.442695, %v2680_v0 }
 0x58c   : > { %3911 = vpow2.f32 %v3264_v1  ;;  %v3265_v62 = vmul.f32 -1.442695, %v2672_v48 }
 0x58d   : > { %3913 = vpow2.f32 %v3267_v13 }
 0x58e   : > { %3915 = vpow2.f32 %v3265_v62  ;;  %v3602_v5 = vpop.f32.mrb[68].mxu1 }
 0x58f   : > { %v2693_v3 = vadd.f32 %v3602_v5, %v5158_v61  ;;  %v2684_v21 = vpop.f32.mrb[69].mxu1 }
 0x590   : > { %v2685_v33 = vadd.f32 %v5158_v61, %v2684_v21  ;;  %v3603_v42 = vpop.f32.mrb[70].mxu1 }
 0x591   : > { %v3270_v19 = vmul.f32 -1.442695, %v2693_v3  ;;  %v2696_v46 = vadd.f32 %v3603_v42, %v5158_v61  ;;  %v2687_v63 = vpop.f32.mrb[71].mxu1 }
 0x592   : > { %v3268_v44 = vmul.f32 -1.442695, %v2685_v33  ;;  %v2688_v43 = vadd.f32 %v5158_v61, %v2687_v63 }
 0x593   : > { %3917 = vpow2.f32 %v3270_v19  ;;  %v3271_v17 = vmul.f32 -1.442695, %v2696_v46 }
 0x594   : > { %3919 = vpow2.f32 %v3268_v44  ;;  %v3269_v55 = vmul.f32 -1.442695, %v2688_v43 }
 0x595   : > { %v3910_v32 = vpop.eup %3909  ;;  %3921 = vpow2.f32 %v3271_v17 }
 0x596   : > { %v3912_v52 = vpop.eup %3911  ;;  %v2893_v36 = vadd.f32 1.0, %v3910_v32  ;;  %3923 = vpow2.f32 %v3269_v55 }
 0x597   : > { %v3914_v57 = vpop.eup %3913  ;;  %v2891_v24 = vadd.f32 1.0, %v3912_v52  ;;  %v3606_v16 = vpop.f32.mrb[72].mxu1 }
 0x598   : > { %v3916_v31 = vpop.eup %3915  ;;  %3925 = vrcp.f32 %v2893_v36  ;;  %v2894_v11 = vadd.f32 1.0, %v3914_v57  ;;  %v2709_v54 = vadd.f32 %v3606_v16, %v5158_v61  ;;  %v2700_v25 = vpop.f32.mrb[73].mxu1 }
 0x599   : > { %3927 = vrcp.f32 %v2891_v24  ;;  %v2892_v22 = vadd.f32 1.0, %v3916_v31  ;;  %v2701_v18 = vadd.f32 %v5158_v61, %v2700_v25  ;;  %v3607_v59 = vpop.f32.mrb[74].mxu1 }
 0x59a   : > { %3929 = vrcp.f32 %v2894_v11  ;;  %v3274_v0 = vmul.f32 -1.442695, %v2709_v54  ;;  %v2712_v29 = vadd.f32 %v3607_v59, %v5158_v61  ;;  %v2703_v1 = vpop.f32.mrb[75].mxu1 }
 0x59b   : > { %3931 = vrcp.f32 %v2892_v22  ;;  %v3272_v48 = vmul.f32 -1.442695, %v2701_v18  ;;  %v2704_v13 = vadd.f32 %v5158_v61, %v2703_v1 }
 0x59c   : > { %3933 = vpow2.f32 %v3274_v0  ;;  %v3275_v62 = vmul.f32 -1.442695, %v2712_v29 }
 0x59d   : > { %v3918_v5 = vpop.eup %3917  ;;  %3935 = vpow2.f32 %v3272_v48  ;;  %v3273_v3 = vmul.f32 -1.442695, %v2704_v13 }
 0x59e   : > { %v3920_v21 = vpop.eup %3919  ;;  %v2897_v33 = vadd.f32 1.0, %v3918_v5  ;;  %3937 = vpow2.f32 %v3275_v62 }
 0x59f   : > { %v3922_v42 = vpop.eup %3921  ;;  %v2895_v19 = vadd.f32 1.0, %v3920_v21  ;;  %3939 = vpow2.f32 %v3273_v3 }
 0x5a0   : > { %v3924_v46 = vpop.eup %3923  ;;  %3941 = vrcp.f32 %v2897_v33  ;;  %v2898_v63 = vadd.f32 1.0, %v3922_v42  ;;  %v3610_v44 = vpop.f32.mrb[76].mxu1 }
 0x5a1   : > { %3943 = vrcp.f32 %v2895_v19  ;;  %v2896_v43 = vadd.f32 1.0, %v3924_v46  ;;  %v2725_v17 = vadd.f32 %v3610_v44, %v5158_v61  ;;  %v2716_v55 = vpop.f32.mrb[77].mxu1 }
 0x5a2   : > { %v3926_v32 = vpop.eup %3925  ;;  %3945 = vrcp.f32 %v2898_v63  ;;  %v2717_v52 = vadd.f32 %v5158_v61, %v2716_v55  ;;  %v3611_v36 = vpop.f32.mrb[78].mxu1 }
 0x5a3   : > { %v3928_v57 = vpop.eup %3927  ;;  %v2989_v24 = vmul.f32 %v3926_v32, %v4977_v28  ;;  %3947 = vrcp.f32 %v2896_v43  ;;  %v3278_v16 = vmul.f32 -1.442695, %v2725_v17  ;;  %v2728_v31 = vadd.f32 %v3611_v36, %v5158_v61  ;;  %v2719_v11 = vpop.f32.mrb[79].mxu1 }
 0x5a4   : > { %v3930_v54 = vpop.eup %3929  ;;  %v2987_v25 = vmul.f32 %v3928_v57, %v4969_v58  ;;  %v3276_v22 = vmul.f32 -1.442695, %v2717_v52  ;;  %v2720_v18 = vadd.f32 %v5158_v61, %v2719_v11 }
 0x5a5   : > { %v3932_v59 = vpop.eup %3931  ;;  %v3021_v0 = vsel %vm1249_vm1, %v2989_v24, 0.0  ;;  %v2990_v29 = vmul.f32 %v3930_v54, %v4983_v45  ;;  %3949 = vpow2.f32 %v3278_v16  ;;  %v3279_v28 = vmul.f32 -1.442695, %v2728_v31 }
 0x5a6   : > { %v3934_v1 = vpop.eup %3933  ;;  %3053 = vst [vmem:[%s5179_s19 + $0x10] sm:$0xff] %v3021_v0  ;;  %v3019_v48 = vsel %vm1249_vm1, %v2987_v25, 0.0  ;;  %v2988_v13 = vmul.f32 %v3932_v59, %v4973_v9  ;;  %3951 = vpow2.f32 %v3276_v22  ;;  %v3277_v58 = vmul.f32 -1.442695, %v2720_v18 }
 0x5a7   : > { %v3936_v62 = vpop.eup %3935  ;;  %3051 = vst [vmem:[%s5179_s19] sm:$0xff] %v3019_v48  ;;  %v3022_v5 = vsel %vm1249_vm1, %v2990_v29, 0.0  ;;  %v2901_v3 = vadd.f32 1.0, %v3934_v1  ;;  %3953 = vpow2.f32 %v3279_v28 }
 0x5a8   : > { %v3938_v21 = vpop.eup %3937  ;;  %3054 = vst [vmem:[%s5179_s19 + $0x18] sm:$0xff] %v3022_v5  ;;  %v3020_v45 = vsel %vm1249_vm1, %v2988_v13, 0.0  ;;  %v2899_v33 = vadd.f32 1.0, %v3936_v62  ;;  %3955 = vpow2.f32 %v3277_v58 }
 0x5a9   : > { %v3940_v42 = vpop.eup %3939  ;;  %3052 = vst [vmem:[%s5179_s19 + $0x8] sm:$0xff] %v3020_v45  ;;  %3957 = vrcp.f32 %v2901_v3  ;;  %v2902_v19 = vadd.f32 1.0, %v3938_v21 }
 0x5aa   : > { %v3942_v9 = vpop.eup %3941  ;;  %3959 = vrcp.f32 %v2899_v33  ;;  %v2900_v46 = vadd.f32 1.0, %v3940_v42 }
 0x5ab   : > { %v3944_v63 = vpop.eup %3943  ;;  %v2993_v44 = vmul.f32 %v3942_v9, %v4999_v34  ;;  %3961 = vrcp.f32 %v2902_v19 }
 0x5ac   : > { %v3946_v43 = vpop.eup %3945  ;;  %v2991_v17 = vmul.f32 %v3944_v63, %v4990_v12  ;;  %3963 = vrcp.f32 %v2900_v46 }
 0x5ad   : > { %v3948_v55 = vpop.eup %3947  ;;  %v3025_v32 = vsel %vm1249_vm1, %v2993_v44, 0.0  ;;  %v2994_v52 = vmul.f32 %v3946_v43, %v5005_v53 }
 0x5ae   : > { %3057 = vst [vmem:[%s5179_s19 + $0x30] sm:$0xff] %v3025_v32  ;;  %v3023_v36 = vsel %vm1249_vm1, %v2991_v17, 0.0  ;;  %v2992_v57 = vmul.f32 %v3948_v55, %v4994_v39  ;;  %v3614_v24 = vpop.f32.mrb[80].mxu1 }
 0x5af   : > { %v3950_v16 = vpop.eup %3949  ;;  %3055 = vst [vmem:[%s5179_s19 + $0x20] sm:$0xff] %v3023_v36  ;;  %v3026_v34 = vsel %vm1249_vm1, %v2994_v52, 0.0  ;;  %v2741_v31 = vadd.f32 %v3614_v24, %v5158_v61  ;;  %v2732_v12 = vpop.f32.mrb[81].mxu1 }
 0x5b0   : > { %v3952_v11 = vpop.eup %3951  ;;  %3058 = vst [vmem:[%s5179_s19 + $0x38] sm:$0xff] %v3026_v34  ;;  %v3024_v54 = vsel %vm1249_vm1, %v2992_v57, 0.0  ;;  %v2905_v25 = vadd.f32 1.0, %v3950_v16  ;;  %v2733_v53 = vadd.f32 %v5158_v61, %v2732_v12  ;;  %v3615_v22 = vpop.f32.mrb[82].mxu1 }
 0x5b1   : > { %v3954_v18 = vpop.eup %3953  ;;  %3056 = vst [vmem:[%s5179_s19 + $0x28] sm:$0xff] %v3024_v54  ;;  %v2903_v59 = vadd.f32 1.0, %v3952_v11  ;;  %v2744_v39 = vadd.f32 %v3615_v22, %v5158_v61  ;;  %v2735_v0 = vpop.f32.mrb[83].mxu1  ;;  %v3282_v1 = vmul.f32 -1.442695, %v2741_v31 }
 0x5b2   : > { %v3956_v29 = vpop.eup %3955  ;;  %3965 = vrcp.f32 %v2905_v25  ;;  %v2906_v28 = vadd.f32 1.0, %v3954_v18  ;;  %v2736_v48 = vadd.f32 %v5158_v61, %v2735_v0  ;;  %v3280_v62 = vmul.f32 -1.442695, %v2733_v53 }
 0x5b3   : > { %v3958_v13 = vpop.eup %3957  ;;  %3967 = vrcp.f32 %v2903_v59  ;;  %v2904_v58 = vadd.f32 1.0, %v3956_v29  ;;  %v3283_v21 = vmul.f32 -1.442695, %v2744_v39 }
 0x5b4   : > { %v3960_v5 = vpop.eup %3959  ;;  %v2997_v3 = vmul.f32 %v3958_v13, %v5021_v51  ;;  %3969 = vrcp.f32 %v2906_v28  ;;  %v3281_v42 = vmul.f32 -1.442695, %v2736_v48 }
 0x5b5   : > { %v3962_v45 = vpop.eup %3961  ;;  %v2995_v33 = vmul.f32 %v3960_v5, %v5010_v2  ;;  %3971 = vrcp.f32 %v2904_v58 }
 0x5b6   : > { %v3964_v19 = vpop.eup %3963  ;;  %v3029_v9 = vsel %vm1249_vm1, %v2997_v3, 0.0  ;;  %v2998_v46 = vmul.f32 %v3962_v45, %v5027_v6  ;;  %3973 = vpow2.f32 %v3282_v1 }
 0x5b7   : > { %3061 = vst [vmem:[%s5179_s19 + $0x50] sm:$0xff] %v3029_v9  ;;  %v3027_v63 = vsel %vm1249_vm1, %v2995_v33, 0.0  ;;  %v2996_v51 = vmul.f32 %v3964_v19, %v5016_v7  ;;  %3975 = vpow2.f32 %v3280_v62 }
 0x5b8   : > { %3059 = vst [vmem:[%s5179_s19 + $0x40] sm:$0xff] %v3027_v63  ;;  %v3030_v44 = vsel %vm1249_vm1, %v2998_v46, 0.0  ;;  %3977 = vpow2.f32 %v3283_v21  ;;  %v3618_v2 = vpop.f32.mrb[84].mxu1 }
 0x5b9   : > { %3062 = vst [vmem:[%s5179_s19 + $0x58] sm:$0xff] %v3030_v44  ;;  %v3028_v43 = vsel %vm1249_vm1, %v2996_v51, 0.0  ;;  %3979 = vpow2.f32 %v3281_v42  ;;  %v2757_v17 = vadd.f32 %v3618_v2, %v5158_v61  ;;  %v2748_v55 = vpop.f32.mrb[85].mxu1 }
 0x5ba   : > { %3060 = vst [vmem:[%s5179_s19 + $0x48] sm:$0xff] %v3028_v43  ;;  %v2749_v6 = vadd.f32 %v5158_v61, %v2748_v55  ;;  %v3619_v32 = vpop.f32.mrb[86].mxu1 }
 0x5bb   : > { %v3286_v52 = vmul.f32 -1.442695, %v2757_v17  ;;  %v2760_v7 = vadd.f32 %v3619_v32, %v5158_v61  ;;  %v2751_v36 = vpop.f32.mrb[87].mxu1 }
 0x5bc   : > { %v3966_v57 = vpop.eup %3965  ;;  %v3284_v24 = vmul.f32 -1.442695, %v2749_v6  ;;  %v2752_v16 = vadd.f32 %v5158_v61, %v2751_v36 }
 0x5bd   : > { %v3968_v34 = vpop.eup %3967  ;;  %v3001_v31 = vmul.f32 %v3966_v57, %v5043_v50  ;;  %3981 = vpow2.f32 %v3286_v52  ;;  %v3287_v12 = vmul.f32 -1.442695, %v2760_v7 }
 0x5be   : > { %v3970_v11 = vpop.eup %3969  ;;  %v2999_v54 = vmul.f32 %v3968_v34, %v5032_v60  ;;  %3983 = vpow2.f32 %v3284_v24  ;;  %v3285_v25 = vmul.f32 -1.442695, %v2752_v16 }
 0x5bf   : > { %v3972_v53 = vpop.eup %3971  ;;  %v3033_v22 = vsel %vm1249_vm1, %v3001_v31, 0.0  ;;  %v3002_v18 = vmul.f32 %v3970_v11, %v5045_v8  ;;  %3985 = vpow2.f32 %v3287_v12 }
 0x5c0   : > { %v3974_v59 = vpop.eup %3973  ;;  %3065 = vst [vmem:[%s5179_s19 + $0x70] sm:$0xff] %v3033_v22  ;;  %v3031_v39 = vsel %vm1249_vm1, %v2999_v54, 0.0  ;;  %v3000_v50 = vmul.f32 %v3972_v53, %v5038_v15  ;;  %3987 = vpow2.f32 %v3285_v25  ;;  %v3622_v0 = vpop.f32.mrb[88].mxu1 }
 0x5c1   : > { %v3976_v29 = vpop.eup %3975  ;;  %3063 = vst [vmem:[%s5179_s19 + $0x60] sm:$0xff] %v3031_v39  ;;  %v3034_v60 = vsel %vm1249_vm1, %v3002_v18, 0.0  ;;  %v2909_v28 = vadd.f32 1.0, %v3974_v59  ;;  %v2773_v1 = vadd.f32 %v3622_v0, %v5158_v61  ;;  %v2764_v48 = vpop.f32.mrb[89].mxu1 }
 0x5c2   : > { %v3978_v13 = vpop.eup %3977  ;;  %3066 = vst [vmem:[%s5179_s19 + $0x78] sm:$0xff] %v3034_v60  ;;  %v3032_v8 = vsel %vm1249_vm1, %v3000_v50, 0.0  ;;  %v2907_v58 = vadd.f32 1.0, %v3976_v29  ;;  %v2765_v62 = vadd.f32 %v5158_v61, %v2764_v48  ;;  %v3623_v5 = vpop.f32.mrb[90].mxu1 }
 0x5c3   : > { %v3980_v15 = vpop.eup %3979  ;;  %3064 = vst [vmem:[%s5179_s19 + $0x68] sm:$0xff] %v3032_v8  ;;  %3989 = vrcp.f32 %v2909_v28  ;;  %v2910_v3 = vadd.f32 1.0, %v3978_v13  ;;  %v3290_v21 = vmul.f32 -1.442695, %v2773_v1  ;;  %v2776_v45 = vadd.f32 %v3623_v5, %v5158_v61  ;;  %v2767_v33 = vpop.f32.mrb[91].mxu1 }
 0x5c4   : > { %3991 = vrcp.f32 %v2907_v58  ;;  %v2908_v42 = vadd.f32 1.0, %v3980_v15  ;;  %v3288_v19 = vmul.f32 -1.442695, %v2765_v62  ;;  %v2768_v46 = vadd.f32 %v5158_v61, %v2767_v33 }
 0x5c5   : > { %3993 = vrcp.f32 %v2910_v3  ;;  %v3291_v9 = vmul.f32 -1.442695, %v2776_v45 }
 0x5c6   : > { %3995 = vrcp.f32 %v2908_v42  ;;  %v3289_v7 = vmul.f32 -1.442695, %v2768_v46 }
 0x5c7   : > { %v3982_v63 = vpop.eup %3981  ;;  %3997 = vpow2.f32 %v3290_v21 }
 0x5c8   : > { %v3984_v51 = vpop.eup %3983  ;;  %v2913_v44 = vadd.f32 1.0, %v3982_v63  ;;  %3999 = vpow2.f32 %v3288_v19  ;;  %v3626_v2 = vpop.f32.mrb[92].mxu1 }
 0x5c9   : > { %v3986_v43 = vpop.eup %3985  ;;  %v2911_v17 = vadd.f32 1.0, %v3984_v51  ;;  %4001 = vpow2.f32 %v3291_v9  ;;  %v2789_v55 = vadd.f32 %v3626_v2, %v5158_v61  ;;  %v2780_v6 = vpop.f32.mrb[93].mxu1 }
 0x5ca   : > { %v3988_v32 = vpop.eup %3987  ;;  %4003 = vrcp.f32 %v2913_v44  ;;  %v2914_v52 = vadd.f32 1.0, %v3986_v43  ;;  %v2781_v36 = vadd.f32 %v5158_v61, %v2780_v6  ;;  %v3627_v57 = vpop.f32.mrb[94].mxu1 }
 0x5cb   : > { %4005 = vrcp.f32 %v2911_v17  ;;  %v2912_v24 = vadd.f32 1.0, %v3988_v32  ;;  %v3294_v16 = vmul.f32 -1.442695, %v2789_v55  ;;  %v2792_v34 = vadd.f32 %v3627_v57, %v5158_v61  ;;  %v2783_v31 = vpop.f32.mrb[95].mxu1 }
 0x5cc   : > { %4007 = vrcp.f32 %v2914_v52  ;;  %v3292_v12 = vmul.f32 -1.442695, %v2781_v36  ;;  %v2784_v11 = vadd.f32 %v5158_v61, %v2783_v31 }
 0x5cd   : > { %v3990_v54 = vpop.eup %3989  ;;  %4009 = vrcp.f32 %v2912_v24  ;;  %v3295_v25 = vmul.f32 -1.442695, %v2792_v34 }
 0x5ce   : > { %v3992_v53 = vpop.eup %3991  ;;  %v3005_v22 = vmul.f32 %v3990_v54, %v5061_v20  ;;  %4011 = vpow2.f32 %v3289_v7  ;;  %v3293_v18 = vmul.f32 -1.442695, %v2784_v11 }
 0x5cf   : > { %v3994_v59 = vpop.eup %3993  ;;  %v3003_v39 = vmul.f32 %v3992_v53, %v5050_v49  ;;  %4013 = vpow2.f32 %v3294_v16 }
 0x5d0   : > { %v3996_v50 = vpop.eup %3995  ;;  %v3037_v0 = vsel %vm1249_vm1, %v3005_v22, 0.0  ;;  %v3006_v61 = vmul.f32 %v3994_v59, %v5067_v14  ;;  %4015 = vpow2.f32 %v3292_v12 }
 0x5d1   : > { %v3998_v29 = vpop.eup %3997  ;;  %3069 = vst [vmem:[%s5179_s19 + $0x90] sm:$0xff] %v3037_v0  ;;  %v3035_v60 = vsel %vm1249_vm1, %v3003_v39, 0.0  ;;  %v3004_v20 = vmul.f32 %v3996_v50, %v5063_v47  ;;  %4017 = vpow2.f32 %v3295_v25 }
 0x5d2   : > { %v4000_v28 = vpop.eup %3999  ;;  %3067 = vst [vmem:[%s5179_s19 + $0x80] sm:$0xff] %v3035_v60  ;;  %v3038_v49 = vsel %vm1249_vm1, %v3006_v61, 0.0  ;;  %v2917_v1 = vadd.f32 1.0, %v3998_v29  ;;  %4019 = vpow2.f32 %v3293_v18 }
 0x5d3   : > { %v4002_v48 = vpop.eup %4001  ;;  %3070 = vst [vmem:[%s5179_s19 + $0x98] sm:$0xff] %v3038_v49  ;;  %v3036_v13 = vsel %vm1249_vm1, %v3004_v20, 0.0  ;;  %v2915_v14 = vadd.f32 1.0, %v4000_v28 }
 0x5d4   : > { %v4004_v8 = vpop.eup %4003  ;;  %3068 = vst [vmem:[%s5179_s19 + $0x88] sm:$0xff] %v3036_v13  ;;  %4021 = vrcp.f32 %v2917_v1  ;;  %v2918_v58 = vadd.f32 1.0, %v4002_v48 }
 0x5d5   : > { %v4006_v62 = vpop.eup %4005  ;;  %v3009_v47 = vmul.f32 %v4004_v8, %v5083_v10  ;;  %4023 = vrcp.f32 %v2915_v14 }
 0x5d6   : > { %v4008_v5 = vpop.eup %4007  ;;  %v3007_v15 = vmul.f32 %v4006_v62, %v5076_v38  ;;  %4025 = vrcp.f32 %v2918_v58 }
 0x5d7   : > { %v4010_v3 = vpop.eup %4009  ;;  %v3041_v21 = vsel %vm1249_vm1, %v3009_v47, 0.0  ;;  %v3010_v45 = vmul.f32 %v4008_v5, %v5093_v30 }
 0x5d8   : > { %v4012_v33 = vpop.eup %4011  ;;  %3073 = vst [vmem:[%s5179_s19 + $0xb0] sm:$0xff] %v3041_v21  ;;  %v3039_v42 = vsel %vm1249_vm1, %v3007_v15, 0.0  ;;  %v3008_v19 = vmul.f32 %v4010_v3, %v5085_v56 }
 0x5d9   : > { %v4014_v9 = vpop.eup %4013  ;;  %3071 = vst [vmem:[%s5179_s19 + $0xa0] sm:$0xff] %v3039_v42  ;;  %v3042_v10 = vsel %vm1249_vm1, %v3010_v45, 0.0  ;;  %v2916_v46 = vadd.f32 1.0, %v4012_v33 }
 0x5da   : > { %v4016_v63 = vpop.eup %4015  ;;  %3074 = vst [vmem:[%s5179_s19 + $0xb8] sm:$0xff] %v3042_v10  ;;  %v3040_v38 = vsel %vm1249_vm1, %v3008_v19, 0.0  ;;  %v2921_v51 = vadd.f32 1.0, %v4014_v9 }
 0x5db   : > { %v4018_v44 = vpop.eup %4017  ;;  %3072 = vst [vmem:[%s5179_s19 + $0xa8] sm:$0xff] %v3040_v38  ;;  %4027 = vrcp.f32 %v2916_v46  ;;  %v2919_v30 = vadd.f32 1.0, %v4016_v63 }
 0x5dc   : > { %v4020_v2 = vpop.eup %4019  ;;  %4029 = vrcp.f32 %v2921_v51  ;;  %v2922_v43 = vadd.f32 1.0, %v4018_v44 }
 0x5dd   : > { %4031 = vrcp.f32 %v2919_v30  ;;  %v2920_v56 = vadd.f32 1.0, %v4020_v2 }
 0x5de   : > { %v4022_v17 = vpop.eup %4021  ;;  %4033 = vrcp.f32 %v2922_v43 }
 0x5df   : > { %v4024_v55 = vpop.eup %4023  ;;  %v3013_v6 = vmul.f32 %v4022_v17, %v5106_v35  ;;  %4035 = vrcp.f32 %v2920_v56 }
 0x5e0   : > { %v4026_v32 = vpop.eup %4025  ;;  %v3011_v52 = vmul.f32 %v4024_v55, %v5095_v23 }
 0x5e1   : > { %v3045_v7 = vsel %vm1249_vm1, %v3013_v6, 0.0  ;;  %v3014_v36 = vmul.f32 %v4026_v32, %v5115_v40 }
 0x5e2   : > { %3077 = vst [vmem:[%s5179_s19 + $0xd0] sm:$0xff] %v3045_v7  ;;  %v3043_v57 = vsel %vm1249_vm1, %v3011_v52, 0.0 }
 0x5e3   : > { %3075 = vst [vmem:[%s5179_s19 + $0xc0] sm:$0xff] %v3043_v57  ;;  %v3046_v24 = vsel %vm1249_vm1, %v3014_v36, 0.0 }
 0x5e4   : > { %3078 = vst [vmem:[%s5179_s19 + $0xd8] sm:$0xff] %v3046_v24 }
 0x5e5   : > { %v4028_v16 = vpop.eup %4027 }
 0x5e6   : > { %v4030_v35 = vpop.eup %4029  ;;  %v3012_v34 = vmul.f32 %v4028_v16, %v5104_v27 }
 0x5e7   : > { %v4032_v23 = vpop.eup %4031  ;;  %v3017_v31 = vmul.f32 %v4030_v35, %v5131_v26 }
 0x5e8   : > { %v4034_v12 = vpop.eup %4033  ;;  %v3044_v40 = vsel %vm1249_vm1, %v3012_v34, 0.0  ;;  %v3015_v11 = vmul.f32 %v4032_v23, %v5117_v4 }
 0x5e9   : > { %v4036_v54 = vpop.eup %4035  ;;  %3076 = vst [vmem:[%s5179_s19 + $0xc8] sm:$0xff] %v3044_v40  ;;  %v3049_v25 = vsel %vm1249_vm1, %v3017_v31, 0.0  ;;  %v3018_v53 = vmul.f32 %v4034_v12, %v5133_v41 }
 0x5ea   : > { %3081 = vst [vmem:[%s5179_s19 + $0xf0] sm:$0xff] %v3049_v25  ;;  %v3047_v22 = vsel %vm1249_vm1, %v3015_v11, 0.0  ;;  %v3016_v27 = vmul.f32 %v4036_v54, %v5126_v37 }
 0x5eb   : > { %3079 = vst [vmem:[%s5179_s19 + $0xe0] sm:$0xff] %v3047_v22  ;;  %v3050_v18 = vsel %vm1249_vm1, %v3018_v53, 0.0 }
 0x5ec   : > { %3082 = vst [vmem:[%s5179_s19 + $0xf8] sm:$0xff] %v3050_v18  ;;  %v3048_v26 = vsel %vm1249_vm1, %v3016_v27, 0.0 }
 0x5ed   : > { %3080 = vst [vmem:[%s5179_s19 + $0xe8] sm:$0xff] %v3048_v26 }
 0x5ee PF: > { %s18_s27 = sadd.s32 1, %s4043_s27  }
 0x5ef   : > { %p15_p4 = scmp.ge.s32.totalorder %s18_s27, 10  }
 0x5f1   :  { %17 = sbr.rel (!%p15_p4) target bundleno = 1 (0x1), region = 82 }

</bundles_post_ra>
